<compile_context>
chip_gen: v7x
topology: tpu7x:2x2x1
jax: 0.10.0
libtpu: 0.0.40
codegen_flags: <defaults>
</compile_context>

<pallas_src>
import functools

import jax
import jax.numpy as jnp
from jax import lax
from jax.experimental import pallas as pl
from jax.experimental.pallas import tpu as pltpu

F32 = jnp.float32
BF16 = jnp.bfloat16
_VMEM = pl.BlockSpec(memory_space=pltpu.MemorySpace.VMEM)


# ------------------------------- fused kernel ------------------------------ #

def _audio_lstm_kernel(xc_ref, wj_ref, cscale_ref, cbias_ref,
                       wih_ref, whh_ref, lb_ref, h0_ref, c0_ref,
                       fcw_ref, fcb_ref, o_ref, ys_ref, *, pool):
    # xc_ref : (pool, Tc4*B, Cin*stride) f32  chunked input, rows (chunk, batch)
    # wj_ref : (nJ, Cin*stride, H)      bf16  conv weight, one matrix per tap
    # cscale/cbias : (1, H) f32               conv-bias + eval-BN folded affine
    # wih/whh: (n_layers, H, 4H) bf16   lb: (n_layers, 1, 4H) f32
    # h0/c0  : (n_layers, B, H) f32     fcw: (H, O) bf16   fcb: (1, O) f32
    # o_ref  : (B, O) f32               ys_ref: (T*B, H) f32 VMEM slab scratch
    nJ = wj_ref.shape[0]
    n_layers, B, H = h0_ref.shape
    TB = ys_ref.shape[0]
    T = TB // B

    cscale = cscale_ref[...]
    cbias = cbias_ref[...]

    # --- hoist + dedupe conv operands (loaded / cast to bf16 exactly once) ---
    needed = sorted({((p + j) % pool, (p + j) // pool)
                     for p in range(pool) for j in range(nJ)})
    xq_full = {q: xc_ref[q] for q in sorted({q for q, _ in needed})}
    xqc = {(q, c): xq_full[q][c * B:c * B + TB, :].astype(BF16)
           for q, c in needed}                        # (T*B, Cin*stride) bf16 each
    wjs = [wj_ref[j] for j in range(nJ)]              # (Cin*stride, H) bf16 each

    # --- Conv1d + BN(eval) + ReLU + MaxPool1d(pool); rows stay (t, b)-major --
    pooled = None
    for p in range(pool):                             # pool phase
        acc = None
        for j in range(nJ):                           # conv tap (stride-sized)
            q, carry = (p + j) % pool, (p + j) // pool
            part = jnp.dot(xqc[(q, carry)], wjs[j], preferred_element_type=F32)
            acc = part if acc is None else acc + part
        yp = jnp.maximum(acc * cscale + cbias, 0.0)   # folded conv-bias/BN + ReLU
        pooled = yp if pooled is None else jnp.maximum(pooled, yp)
    # pooled: (T*B, H) f32, time-major rows

    # --------------- stacked LSTM (hoisted input projection) ---------------- #
    gin = pooled
    mx = None
    for l in range(n_layers):
        wih_l = wih_ref[l]                            # (Hin, 4H) bf16
        whh_l = whh_ref[l]                            # (H,   4H) bf16
        b_l = lb_ref[l]                               # (1,   4H) f32
        # all-timestep input projection: one matmul, off the recurrent path
        gx = jnp.dot(gin.astype(BF16), wih_l, preferred_element_type=F32) + b_l
        h = h0_ref[l]                                 # (B, H) f32, lives in vregs
        c = c0_ref[l]
        mx = None
        for t in range(T):                            # fully unrolled (T static)
            g = gx[t * B:(t + 1) * B, :] + jnp.dot(
                h.astype(BF16), whh_l, preferred_element_type=F32)
            sg = jax.nn.sigmoid(g)                    # full 4H(=128)-lane width
            tg = jnp.tanh(g)
            i_g = sg[:, 0 * H:1 * H]
            f_g = sg[:, 1 * H:2 * H]
            g_g = tg[:, 2 * H:3 * H]
            o_g = sg[:, 3 * H:4 * H]
            c = f_g * c + i_g * g_g
            h = o_g * jnp.tanh(c)
            if l + 1 < n_layers:
                ys_ref[pl.ds(t * B, B), :] = h        # slab write, off crit. path
            else:
                mx = h if mx is None else jnp.maximum(mx, h)
        if l + 1 < n_layers:
            gin = ys_ref[...]                         # (T*B, H) feeds next layer
        # TODO(synk): nn.LSTM inter-layer dropout(p=0.1) is a no-op in eval mode.

    # ---------------- global max over time (mx) + final Linear -------------- #
    o_ref[...] = jnp.dot(mx.astype(BF16), fcw_ref[...],
                         preferred_element_type=F32) + fcb_ref[...]


# ------------------------------ forward wrapper ----------------------------- #

def audio_lstm_forward(x, params, h0, c0, *, stride=16, pool=4):
    conv_w = params["conv_w"]                         # (H, Cin, K)
    H, Cin, K = conv_w.shape
    B, _, L = x.shape
    assert K % stride == 0
    nJ = K // stride
    T_conv = (L - K) // stride + 1
    T = T_conv // pool                                # MaxPool1d drops remainder
    n_layers = len(params["lstm"])
    O = params["fc_w"].shape[0]

    # --- host-side layout prep (pure layout, no data duplication, jit-fused) --
    T_chunks = pool * T + nJ - 1                      # stride-chunks consumed
    Tc4 = pl.cdiv(T_chunks, pool)
    xw = x[:, :, :T_chunks * stride]
    pad = Tc4 * pool - T_chunks
    if pad:
        xw = jnp.pad(xw, ((0, 0), (0, 0), (0, pad * stride)))
    # xc4[q, u*B + b, cin*stride + s] = x[b, cin, (u*pool + q)*stride + s]
    xc4 = (xw.reshape(B, Cin, Tc4, pool, stride)
             .transpose(3, 2, 0, 1, 4)
             .reshape(pool, Tc4 * B, Cin * stride)).astype(F32)
    # conv weight split into nJ taps: wj[j, cin*stride+s, h] = W[h, cin, j*stride+s]
    wj = (conv_w.reshape(H, Cin, nJ, stride)
                .transpose(2, 1, 3, 0)
                .reshape(nJ, Cin * stride, H)).astype(BF16)
    # eval-mode BatchNorm folded with the conv bias
    eps = 1e-5
    scale = params["bn_gamma"] / jnp.sqrt(params["bn_var"] + eps)
    bias = params["bn_beta"] + (params["conv_b"] - params["bn_mean"]) * scale

    wih = jnp.stack([lp["w_ih"].T for lp in params["lstm"]]).astype(BF16)
    whh = jnp.stack([lp["w_hh"].T for lp in params["lstm"]]).astype(BF16)
    lb = jnp.stack([(lp["b_ih"] + lp["b_hh"]).reshape(1, 4 * H)
                    for lp in params["lstm"]]).astype(F32)

    kernel = functools.partial(_audio_lstm_kernel, pool=pool)
    return pl.pallas_call(
        kernel,
        out_shape=jax.ShapeDtypeStruct((B, O), F32),
        in_specs=[_VMEM] * 11,
        out_specs=_VMEM,
        scratch_shapes=[pltpu.VMEM((T * B, H), F32)],
    )(xc4, wj,
      scale.reshape(1, H).astype(F32), bias.reshape(1, H).astype(F32),
      wih, whh, lb, h0.astype(F32), c0.astype(F32),
      params["fc_w"].T.astype(BF16), params["fc_b"].reshape(1, O).astype(F32))


# ---------------------------- pure-JAX reference ---------------------------- #

def reference_forward(x, params, h0, c0, *, stride=16, pool=4):
    conv_w = params["conv_w"]
    H, Cin, K = conv_w.shape
    B, _, L = x.shape
    T_conv = (L - K) // stride + 1
    T = T_conv // pool

    idx = jnp.arange(T_conv)[:, None] * stride + jnp.arange(K)[None, :]
    patches = x[:, :, idx]                            # (B, Cin, T_conv, K)
    patches = patches.transpose(0, 2, 1, 3).reshape(B * T_conv, Cin * K)
    w_mat = conv_w.reshape(H, Cin * K).T
    y = jnp.dot(patches.astype(BF16), w_mat.astype(BF16),
                preferred_element_type=F32) + params["conv_b"][None, :]
    eps = 1e-5
    scale = params["bn_gamma"] / jnp.sqrt(params["bn_var"] + eps)
    shift = params["bn_beta"] - params["bn_mean"] * scale
    y = jnp.maximum(y * scale[None, :] + shift[None, :], 0.0)
    y = y.reshape(B, T_conv, H)[:, :T * pool]
    seq = y.reshape(B, T, pool, H).max(axis=2)        # (B, T, H)

    for l, layer in enumerate(params["lstm"]):
        wih = layer["w_ih"].T.astype(BF16)
        whh = layer["w_hh"].T.astype(BF16)
        b = (layer["b_ih"] + layer["b_hh"])[None, :]

        def step(carry, x_t):
            h, c = carry
            g = (jnp.dot(x_t.astype(BF16), wih, preferred_element_type=F32)
                 + jnp.dot(h.astype(BF16), whh, preferred_element_type=F32)
                 + b)
            i, f, gg, o = jnp.split(g, 4, axis=-1)
            c = jax.nn.sigmoid(f) * c + jax.nn.sigmoid(i) * jnp.tanh(gg)
            h = jax.nn.sigmoid(o) * jnp.tanh(c)
            return (h, c), h

        (_, _), ys = lax.scan(step, (h0[l], c0[l]), seq.transpose(1, 0, 2))
        seq = ys.transpose(1, 0, 2)

    pooled = seq.max(axis=1)                          # global max over time
    return (jnp.dot(pooled.astype(BF16), params["fc_w"].T.astype(BF16),
                    preferred_element_type=F32) + params["fc_b"][None, :])


# ----------------------------------- main ----------------------------------- #

if __name__ == "__main__":
    B, Cin, H, n_layers, O = 2, 1, 32, 2, 10
    stride, K, pool = 16, 80, 4
    T_conv = 32
    L = (T_conv - 1) * stride + K                     # 576

    key = jax.random.PRNGKey(0)
    ks = jax.random.split(key, 8 + 4 * n_layers)

    params = {
        "conv_w": 0.1 * jax.random.normal(ks[0], (H, Cin, K), F32),
        "conv_b": 0.1 * jax.random.normal(ks[1], (H,), F32),
        "bn_gamma": 1.0 + 0.1 * jax.random.normal(ks[2], (H,), F32),
        "bn_beta": 0.1 * jax.random.normal(ks[3], (H,), F32),
        "bn_mean": 0.05 * jax.random.normal(ks[4], (H,), F32),
        "bn_var": 1.0 + 0.1 * jnp.abs(jax.random.normal(ks[5], (H,), F32)),
        "fc_w": 0.1 * jax.random.normal(ks[6], (O, H), F32),
        "fc_b": 0.1 * jax.random.normal(ks[7], (O,), F32),
        "lstm": [],
    }
    for l in range(n_layers):
        base = 8 + 4 * l
        params["lstm"].append({
            "w_ih": 0.1 * jax.random.normal(ks[base + 0], (4 * H, H), F32),
            "w_hh": 0.1 * jax.random.normal(ks[base + 1], (4 * H, H), F32),
            "b_ih": 0.1 * jax.random.normal(ks[base + 2], (4 * H,), F32),
            "b_hh": 0.1 * jax.random.normal(ks[base + 3], (4 * H,), F32),
        })

    kx, kh, kc = jax.random.split(jax.random.PRNGKey(1), 3)
    x = jax.random.normal(kx, (B, Cin, L), F32)
    h0 = jax.random.normal(kh, (n_layers, B, H), F32)    # deterministic init_hidden
    c0 = jax.random.normal(kc, (n_layers, B, H), F32)

    fwd = jax.jit(audio_lstm_forward)
    out = jax.block_until_ready(fwd(x, params, h0, c0))

    ref = reference_forward(x, params, h0, c0)
    assert out.shape == (B, O), out.shape
    err = float(jnp.max(jnp.abs(out - ref)))
    assert jnp.allclose(out, ref, atol=2e-3, rtol=2e-3), err
    print("KERNEL_OK")
</pallas_src>

<mosaic_0001>
module attributes {stable_mosaic.version = 11 : i64} {
  func.func @_audio_lstm_kernel(%arg0: memref<4x18x16xf32, #tpu.memory_space<vmem>>, %arg1: memref<5x16x32xbf16, #tpu.memory_space<vmem>>, %arg2: memref<1x32xf32, #tpu.memory_space<vmem>>, %arg3: memref<1x32xf32, #tpu.memory_space<vmem>>, %arg4: memref<2x32x128xbf16, #tpu.memory_space<vmem>>, %arg5: memref<2x32x128xbf16, #tpu.memory_space<vmem>>, %arg6: memref<2x1x128xf32, #tpu.memory_space<vmem>>, %arg7: memref<2x2x32xf32, #tpu.memory_space<vmem>>, %arg8: memref<2x2x32xf32, #tpu.memory_space<vmem>>, %arg9: memref<32x10xbf16, #tpu.memory_space<vmem>>, %arg10: memref<1x10xf32, #tpu.memory_space<vmem>>, %arg11: memref<2x10xf32, #tpu.memory_space<vmem>>, %arg12: memref<16x32xf32, #tpu.memory_space<vmem>>) attributes {dimension_semantics = [], scalar_prefetch = 0 : i64, scratch_operands = 1 : i64, tpu.core_type = #tpu.core_type<tc>} {
    %c0 = arith.constant 0 : index
    %c0_0 = arith.constant 0 : index
    %0 = vector.load %arg2[%c0, %c0_0] : memref<1x32xf32, #tpu.memory_space<vmem>>, vector<1x32xf32>
    %c0_1 = arith.constant 0 : index
    %c0_2 = arith.constant 0 : index
    %1 = vector.load %arg3[%c0_1, %c0_2] : memref<1x32xf32, #tpu.memory_space<vmem>>, vector<1x32xf32>
    %c0_3 = arith.constant 0 : index
    %c0_4 = arith.constant 0 : index
    %c0_5 = arith.constant 0 : index
    %2 = vector.load %arg0[%c0_3, %c0_4, %c0_5] : memref<4x18x16xf32, #tpu.memory_space<vmem>>, vector<1x18x16xf32>
    %3 = vector.shape_cast %2 : vector<1x18x16xf32> to vector<18x16xf32>
    %c1 = arith.constant 1 : index
    %c0_6 = arith.constant 0 : index
    %c0_7 = arith.constant 0 : index
    %4 = vector.load %arg0[%c1, %c0_6, %c0_7] : memref<4x18x16xf32, #tpu.memory_space<vmem>>, vector<1x18x16xf32>
    %5 = vector.shape_cast %4 : vector<1x18x16xf32> to vector<18x16xf32>
    %c2 = arith.constant 2 : index
    %c0_8 = arith.constant 0 : index
    %c0_9 = arith.constant 0 : index
    %6 = vector.load %arg0[%c2, %c0_8, %c0_9] : memref<4x18x16xf32, #tpu.memory_space<vmem>>, vector<1x18x16xf32>
    %7 = vector.shape_cast %6 : vector<1x18x16xf32> to vector<18x16xf32>
    %c3 = arith.constant 3 : index
    %c0_10 = arith.constant 0 : index
    %c0_11 = arith.constant 0 : index
    %8 = vector.load %arg0[%c3, %c0_10, %c0_11] : memref<4x18x16xf32, #tpu.memory_space<vmem>>, vector<1x18x16xf32>
    %9 = vector.shape_cast %8 : vector<1x18x16xf32> to vector<18x16xf32>
    %10 = vector.extract_strided_slice %3 {offsets = [0, 0], sizes = [16, 16], strides = [1, 1]} : vector<18x16xf32> to vector<16x16xf32>
    %11 = arith.truncf %10 : vector<16x16xf32> to vector<16x16xbf16>
    %12 = vector.extract_strided_slice %3 {offsets = [2, 0], sizes = [16, 16], strides = [1, 1]} : vector<18x16xf32> to vector<16x16xf32>
    %13 = arith.truncf %12 : vector<16x16xf32> to vector<16x16xbf16>
    %14 = vector.extract_strided_slice %5 {offsets = [0, 0], sizes = [16, 16], strides = [1, 1]} : vector<18x16xf32> to vector<16x16xf32>
    %15 = arith.truncf %14 : vector<16x16xf32> to vector<16x16xbf16>
    %16 = vector.extract_strided_slice %5 {offsets = [2, 0], sizes = [16, 16], strides = [1, 1]} : vector<18x16xf32> to vector<16x16xf32>
    %17 = arith.truncf %16 : vector<16x16xf32> to vector<16x16xbf16>
    %18 = vector.extract_strided_slice %7 {offsets = [0, 0], sizes = [16, 16], strides = [1, 1]} : vector<18x16xf32> to vector<16x16xf32>
    %19 = arith.truncf %18 : vector<16x16xf32> to vector<16x16xbf16>
    %20 = vector.extract_strided_slice %7 {offsets = [2, 0], sizes = [16, 16], strides = [1, 1]} : vector<18x16xf32> to vector<16x16xf32>
    %21 = arith.truncf %20 : vector<16x16xf32> to vector<16x16xbf16>
    %22 = vector.extract_strided_slice %9 {offsets = [0, 0], sizes = [16, 16], strides = [1, 1]} : vector<18x16xf32> to vector<16x16xf32>
    %23 = arith.truncf %22 : vector<16x16xf32> to vector<16x16xbf16>
    %24 = vector.extract_strided_slice %9 {offsets = [2, 0], sizes = [16, 16], strides = [1, 1]} : vector<18x16xf32> to vector<16x16xf32>
    %25 = arith.truncf %24 : vector<16x16xf32> to vector<16x16xbf16>
    %c0_12 = arith.constant 0 : index
    %c0_13 = arith.constant 0 : index
    %c0_14 = arith.constant 0 : index
    %26 = vector.load %arg1[%c0_12, %c0_13, %c0_14] : memref<5x16x32xbf16, #tpu.memory_space<vmem>>, vector<1x16x32xbf16>
    %27 = vector.shape_cast %26 : vector<1x16x32xbf16> to vector<16x32xbf16>
    %c1_15 = arith.constant 1 : index
    %c0_16 = arith.constant 0 : index
    %c0_17 = arith.constant 0 : index
    %28 = vector.load %arg1[%c1_15, %c0_16, %c0_17] : memref<5x16x32xbf16, #tpu.memory_space<vmem>>, vector<1x16x32xbf16>
    %29 = vector.shape_cast %28 : vector<1x16x32xbf16> to vector<16x32xbf16>
    %c2_18 = arith.constant 2 : index
    %c0_19 = arith.constant 0 : index
    %c0_20 = arith.constant 0 : index
    %30 = vector.load %arg1[%c2_18, %c0_19, %c0_20] : memref<5x16x32xbf16, #tpu.memory_space<vmem>>, vector<1x16x32xbf16>
    %31 = vector.shape_cast %30 : vector<1x16x32xbf16> to vector<16x32xbf16>
    %c3_21 = arith.constant 3 : index
    %c0_22 = arith.constant 0 : index
    %c0_23 = arith.constant 0 : index
    %32 = vector.load %arg1[%c3_21, %c0_22, %c0_23] : memref<5x16x32xbf16, #tpu.memory_space<vmem>>, vector<1x16x32xbf16>
    %33 = vector.shape_cast %32 : vector<1x16x32xbf16> to vector<16x32xbf16>
    %c4 = arith.constant 4 : index
    %c0_24 = arith.constant 0 : index
    %c0_25 = arith.constant 0 : index
    %34 = vector.load %arg1[%c4, %c0_24, %c0_25] : memref<5x16x32xbf16, #tpu.memory_space<vmem>>, vector<1x16x32xbf16>
    %35 = vector.shape_cast %34 : vector<1x16x32xbf16> to vector<16x32xbf16>
    %cst = arith.constant dense<0.000000e+00> : vector<16x32xf32>
    %36 = tpu.matmul %11, %27, %cst {dimension_numbers = #tpu.dot_dimension_numbers<[1], [0], [0], [1], [0, 0, 1, 1], [], []>} : vector<16x16xbf16>, vector<16x32xbf16>, vector<16x32xf32> -> vector<16x32xf32>
    %cst_26 = arith.constant dense<0.000000e+00> : vector<16x32xf32>
    %37 = tpu.matmul %15, %29, %cst_26 {dimension_numbers = #tpu.dot_dimension_numbers<[1], [0], [0], [1], [0, 0, 1, 1], [], []>} : vector<16x16xbf16>, vector<16x32xbf16>, vector<16x32xf32> -> vector<16x32xf32>
    %38 = arith.addf %36, %37 : vector<16x32xf32>
    %cst_27 = arith.constant dense<0.000000e+00> : vector<16x32xf32>
    %39 = tpu.matmul %19, %31, %cst_27 {dimension_numbers = #tpu.dot_dimension_numbers<[1], [0], [0], [1], [0, 0, 1, 1], [], []>} : vector<16x16xbf16>, vector<16x32xbf16>, vector<16x32xf32> -> vector<16x32xf32>
    %40 = arith.addf %38, %39 : vector<16x32xf32>
    %cst_28 = arith.constant dense<0.000000e+00> : vector<16x32xf32>
    %41 = tpu.matmul %23, %33, %cst_28 {dimension_numbers = #tpu.dot_dimension_numbers<[1], [0], [0], [1], [0, 0, 1, 1], [], []>} : vector<16x16xbf16>, vector<16x32xbf16>, vector<16x32xf32> -> vector<16x32xf32>
    %42 = arith.addf %40, %41 : vector<16x32xf32>
    %cst_29 = arith.constant dense<0.000000e+00> : vector<16x32xf32>
    %43 = tpu.matmul %13, %35, %cst_29 {dimension_numbers = #tpu.dot_dimension_numbers<[1], [0], [0], [1], [0, 0, 1, 1], [], []>} : vector<16x16xbf16>, vector<16x32xbf16>, vector<16x32xf32> -> vector<16x32xf32>
    %44 = arith.addf %42, %43 : vector<16x32xf32>
    %45 = vector.broadcast %0 : vector<1x32xf32> to vector<16x32xf32>
    %46 = arith.mulf %44, %45 : vector<16x32xf32>
    %47 = vector.broadcast %1 : vector<1x32xf32> to vector<16x32xf32>
    %48 = arith.addf %46, %47 : vector<16x32xf32>
    %cst_30 = arith.constant 0.000000e+00 : f32
    %49 = vector.broadcast %cst_30 : f32 to vector<16x32xf32>
    %50 = arith.maximumf %48, %49 : vector<16x32xf32>
    %cst_31 = arith.constant dense<0.000000e+00> : vector<16x32xf32>
    %51 = tpu.matmul %15, %27, %cst_31 {dimension_numbers = #tpu.dot_dimension_numbers<[1], [0], [0], [1], [0, 0, 1, 1], [], []>} : vector<16x16xbf16>, vector<16x32xbf16>, vector<16x32xf32> -> vector<16x32xf32>
    %cst_32 = arith.constant dense<0.000000e+00> : vector<16x32xf32>
    %52 = tpu.matmul %19, %29, %cst_32 {dimension_numbers = #tpu.dot_dimension_numbers<[1], [0], [0], [1], [0, 0, 1, 1], [], []>} : vector<16x16xbf16>, vector<16x32xbf16>, vector<16x32xf32> -> vector<16x32xf32>
    %53 = arith.addf %51, %52 : vector<16x32xf32>
    %cst_33 = arith.constant dense<0.000000e+00> : vector<16x32xf32>
    %54 = tpu.matmul %23, %31, %cst_33 {dimension_numbers = #tpu.dot_dimension_numbers<[1], [0], [0], [1], [0, 0, 1, 1], [], []>} : vector<16x16xbf16>, vector<16x32xbf16>, vector<16x32xf32> -> vector<16x32xf32>
    %55 = arith.addf %53, %54 : vector<16x32xf32>
    %cst_34 = arith.constant dense<0.000000e+00> : vector<16x32xf32>
    %56 = tpu.matmul %13, %33, %cst_34 {dimension_numbers = #tpu.dot_dimension_numbers<[1], [0], [0], [1], [0, 0, 1, 1], [], []>} : vector<16x16xbf16>, vector<16x32xbf16>, vector<16x32xf32> -> vector<16x32xf32>
    %57 = arith.addf %55, %56 : vector<16x32xf32>
    %cst_35 = arith.constant dense<0.000000e+00> : vector<16x32xf32>
    %58 = tpu.matmul %17, %35, %cst_35 {dimension_numbers = #tpu.dot_dimension_numbers<[1], [0], [0], [1], [0, 0, 1, 1], [], []>} : vector<16x16xbf16>, vector<16x32xbf16>, vector<16x32xf32> -> vector<16x32xf32>
    %59 = arith.addf %57, %58 : vector<16x32xf32>
    %60 = vector.broadcast %0 : vector<1x32xf32> to vector<16x32xf32>
    %61 = arith.mulf %59, %60 : vector<16x32xf32>
    %62 = vector.broadcast %1 : vector<1x32xf32> to vector<16x32xf32>
    %63 = arith.addf %61, %62 : vector<16x32xf32>
    %cst_36 = arith.constant 0.000000e+00 : f32
    %64 = vector.broadcast %cst_36 : f32 to vector<16x32xf32>
    %65 = arith.maximumf %63, %64 : vector<16x32xf32>
    %66 = arith.maximumf %50, %65 : vector<16x32xf32>
    %cst_37 = arith.constant dense<0.000000e+00> : vector<16x32xf32>
    %67 = tpu.matmul %19, %27, %cst_37 {dimension_numbers = #tpu.dot_dimension_numbers<[1], [0], [0], [1], [0, 0, 1, 1], [], []>} : vector<16x16xbf16>, vector<16x32xbf16>, vector<16x32xf32> -> vector<16x32xf32>
    %cst_38 = arith.constant dense<0.000000e+00> : vector<16x32xf32>
    %68 = tpu.matmul %23, %29, %cst_38 {dimension_numbers = #tpu.dot_dimension_numbers<[1], [0], [0], [1], [0, 0, 1, 1], [], []>} : vector<16x16xbf16>, vector<16x32xbf16>, vector<16x32xf32> -> vector<16x32xf32>
    %69 = arith.addf %67, %68 : vector<16x32xf32>
    %cst_39 = arith.constant dense<0.000000e+00> : vector<16x32xf32>
    %70 = tpu.matmul %13, %31, %cst_39 {dimension_numbers = #tpu.dot_dimension_numbers<[1], [0], [0], [1], [0, 0, 1, 1], [], []>} : vector<16x16xbf16>, vector<16x32xbf16>, vector<16x32xf32> -> vector<16x32xf32>
    %71 = arith.addf %69, %70 : vector<16x32xf32>
    %cst_40 = arith.constant dense<0.000000e+00> : vector<16x32xf32>
    %72 = tpu.matmul %17, %33, %cst_40 {dimension_numbers = #tpu.dot_dimension_numbers<[1], [0], [0], [1], [0, 0, 1, 1], [], []>} : vector<16x16xbf16>, vector<16x32xbf16>, vector<16x32xf32> -> vector<16x32xf32>
    %73 = arith.addf %71, %72 : vector<16x32xf32>
    %cst_41 = arith.constant dense<0.000000e+00> : vector<16x32xf32>
    %74 = tpu.matmul %21, %35, %cst_41 {dimension_numbers = #tpu.dot_dimension_numbers<[1], [0], [0], [1], [0, 0, 1, 1], [], []>} : vector<16x16xbf16>, vector<16x32xbf16>, vector<16x32xf32> -> vector<16x32xf32>
    %75 = arith.addf %73, %74 : vector<16x32xf32>
    %76 = vector.broadcast %0 : vector<1x32xf32> to vector<16x32xf32>
    %77 = arith.mulf %75, %76 : vector<16x32xf32>
    %78 = vector.broadcast %1 : vector<1x32xf32> to vector<16x32xf32>
    %79 = arith.addf %77, %78 : vector<16x32xf32>
    %cst_42 = arith.constant 0.000000e+00 : f32
    %80 = vector.broadcast %cst_42 : f32 to vector<16x32xf32>
    %81 = arith.maximumf %79, %80 : vector<16x32xf32>
    %82 = arith.maximumf %66, %81 : vector<16x32xf32>
    %cst_43 = arith.constant dense<0.000000e+00> : vector<16x32xf32>
    %83 = tpu.matmul %23, %27, %cst_43 {dimension_numbers = #tpu.dot_dimension_numbers<[1], [0], [0], [1], [0, 0, 1, 1], [], []>} : vector<16x16xbf16>, vector<16x32xbf16>, vector<16x32xf32> -> vector<16x32xf32>
    %cst_44 = arith.constant dense<0.000000e+00> : vector<16x32xf32>
    %84 = tpu.matmul %13, %29, %cst_44 {dimension_numbers = #tpu.dot_dimension_numbers<[1], [0], [0], [1], [0, 0, 1, 1], [], []>} : vector<16x16xbf16>, vector<16x32xbf16>, vector<16x32xf32> -> vector<16x32xf32>
    %85 = arith.addf %83, %84 : vector<16x32xf32>
    %cst_45 = arith.constant dense<0.000000e+00> : vector<16x32xf32>
    %86 = tpu.matmul %17, %31, %cst_45 {dimension_numbers = #tpu.dot_dimension_numbers<[1], [0], [0], [1], [0, 0, 1, 1], [], []>} : vector<16x16xbf16>, vector<16x32xbf16>, vector<16x32xf32> -> vector<16x32xf32>
    %87 = arith.addf %85, %86 : vector<16x32xf32>
    %cst_46 = arith.constant dense<0.000000e+00> : vector<16x32xf32>
    %88 = tpu.matmul %21, %33, %cst_46 {dimension_numbers = #tpu.dot_dimension_numbers<[1], [0], [0], [1], [0, 0, 1, 1], [], []>} : vector<16x16xbf16>, vector<16x32xbf16>, vector<16x32xf32> -> vector<16x32xf32>
    %89 = arith.addf %87, %88 : vector<16x32xf32>
    %cst_47 = arith.constant dense<0.000000e+00> : vector<16x32xf32>
    %90 = tpu.matmul %25, %35, %cst_47 {dimension_numbers = #tpu.dot_dimension_numbers<[1], [0], [0], [1], [0, 0, 1, 1], [], []>} : vector<16x16xbf16>, vector<16x32xbf16>, vector<16x32xf32> -> vector<16x32xf32>
    %91 = arith.addf %89, %90 : vector<16x32xf32>
    %92 = vector.broadcast %0 : vector<1x32xf32> to vector<16x32xf32>
    %93 = arith.mulf %91, %92 : vector<16x32xf32>
    %94 = vector.broadcast %1 : vector<1x32xf32> to vector<16x32xf32>
    %95 = arith.addf %93, %94 : vector<16x32xf32>
    %cst_48 = arith.constant 0.000000e+00 : f32
    %96 = vector.broadcast %cst_48 : f32 to vector<16x32xf32>
    %97 = arith.maximumf %95, %96 : vector<16x32xf32>
    %98 = arith.maximumf %82, %97 : vector<16x32xf32>
    %c0_49 = arith.constant 0 : index
    %c0_50 = arith.constant 0 : index
    %c0_51 = arith.constant 0 : index
    %99 = vector.load %arg4[%c0_49, %c0_50, %c0_51] : memref<2x32x128xbf16, #tpu.memory_space<vmem>>, vector<1x32x128xbf16>
    %100 = vector.shape_cast %99 : vector<1x32x128xbf16> to vector<32x128xbf16>
    %c0_52 = arith.constant 0 : index
    %c0_53 = arith.constant 0 : index
    %c0_54 = arith.constant 0 : index
    %101 = vector.load %arg5[%c0_52, %c0_53, %c0_54] : memref<2x32x128xbf16, #tpu.memory_space<vmem>>, vector<1x32x128xbf16>
    %102 = vector.shape_cast %101 : vector<1x32x128xbf16> to vector<32x128xbf16>
    %c0_55 = arith.constant 0 : index
    %c0_56 = arith.constant 0 : index
    %c0_57 = arith.constant 0 : index
    %103 = vector.load %arg6[%c0_55, %c0_56, %c0_57] : memref<2x1x128xf32, #tpu.memory_space<vmem>>, vector<1x1x128xf32>
    %104 = vector.shape_cast %103 : vector<1x1x128xf32> to vector<1x128xf32>
    %105 = arith.truncf %98 : vector<16x32xf32> to vector<16x32xbf16>
    %cst_58 = arith.constant dense<0.000000e+00> : vector<16x128xf32>
    %106 = tpu.matmul %105, %100, %cst_58 {dimension_numbers = #tpu.dot_dimension_numbers<[1], [0], [0], [1], [0, 0, 1, 1], [], []>} : vector<16x32xbf16>, vector<32x128xbf16>, vector<16x128xf32> -> vector<16x128xf32>
    %107 = vector.broadcast %104 : vector<1x128xf32> to vector<16x128xf32>
    %108 = arith.addf %106, %107 : vector<16x128xf32>
    %c0_59 = arith.constant 0 : index
    %c0_60 = arith.constant 0 : index
    %c0_61 = arith.constant 0 : index
    %109 = vector.load %arg7[%c0_59, %c0_60, %c0_61] : memref<2x2x32xf32, #tpu.memory_space<vmem>>, vector<1x2x32xf32>
    %110 = vector.shape_cast %109 : vector<1x2x32xf32> to vector<2x32xf32>
    %c0_62 = arith.constant 0 : index
    %c0_63 = arith.constant 0 : index
    %c0_64 = arith.constant 0 : index
    %111 = vector.load %arg8[%c0_62, %c0_63, %c0_64] : memref<2x2x32xf32, #tpu.memory_space<vmem>>, vector<1x2x32xf32>
    %112 = vector.shape_cast %111 : vector<1x2x32xf32> to vector<2x32xf32>
    %113 = vector.extract_strided_slice %108 {offsets = [0, 0], sizes = [2, 128], strides = [1, 1]} : vector<16x128xf32> to vector<2x128xf32>
    %114 = arith.truncf %110 : vector<2x32xf32> to vector<2x32xbf16>
    %cst_65 = arith.constant dense<0.000000e+00> : vector<2x128xf32>
    %115 = tpu.matmul %114, %102, %cst_65 {dimension_numbers = #tpu.dot_dimension_numbers<[1], [0], [0], [1], [0, 0, 1, 1], [], []>} : vector<2x32xbf16>, vector<32x128xbf16>, vector<2x128xf32> -> vector<2x128xf32>
    %116 = arith.addf %113, %115 : vector<2x128xf32>
    %117 = arith.negf %116 : vector<2x128xf32>
    %118 = math.exp %117 : vector<2x128xf32>
    %cst_66 = arith.constant 1.000000e+00 : f32
    %119 = vector.broadcast %cst_66 : f32 to vector<2x128xf32>
    %120 = arith.addf %119, %118 : vector<2x128xf32>
    %121 = arith.divf %119, %120 : vector<2x128xf32>
    %122 = math.tanh %116 : vector<2x128xf32>
    %123 = vector.extract_strided_slice %121 {offsets = [0, 0], sizes = [2, 32], strides = [1, 1]} : vector<2x128xf32> to vector<2x32xf32>
    %124 = vector.extract_strided_slice %121 {offsets = [0, 32], sizes = [2, 32], strides = [1, 1]} : vector<2x128xf32> to vector<2x32xf32>
    %125 = vector.extract_strided_slice %122 {offsets = [0, 64], sizes = [2, 32], strides = [1, 1]} : vector<2x128xf32> to vector<2x32xf32>
    %126 = vector.extract_strided_slice %121 {offsets = [0, 96], sizes = [2, 32], strides = [1, 1]} : vector<2x128xf32> to vector<2x32xf32>
    %127 = arith.mulf %124, %112 : vector<2x32xf32>
    %128 = arith.mulf %123, %125 : vector<2x32xf32>
    %129 = arith.addf %127, %128 : vector<2x32xf32>
    %130 = math.tanh %129 : vector<2x32xf32>
    %131 = arith.mulf %126, %130 : vector<2x32xf32>
    %c0_67 = arith.constant 0 : index
    %c0_68 = arith.constant 0 : index
    %132 = vector.load %arg12[%c0_67, %c0_68] : memref<16x32xf32, #tpu.memory_space<vmem>>, vector<2x32xf32>
    tpu.vector_store %arg12[%c0_67, %c0_68], %131 {strides = array<i32>} : memref<16x32xf32, #tpu.memory_space<vmem>>, vector<2x32xf32>,
    %133 = vector.extract_strided_slice %108 {offsets = [2, 0], sizes = [2, 128], strides = [1, 1]} : vector<16x128xf32> to vector<2x128xf32>
    %134 = arith.truncf %131 : vector<2x32xf32> to vector<2x32xbf16>
    %cst_69 = arith.constant dense<0.000000e+00> : vector<2x128xf32>
    %135 = tpu.matmul %134, %102, %cst_69 {dimension_numbers = #tpu.dot_dimension_numbers<[1], [0], [0], [1], [0, 0, 1, 1], [], []>} : vector<2x32xbf16>, vector<32x128xbf16>, vector<2x128xf32> -> vector<2x128xf32>
    %136 = arith.addf %133, %135 : vector<2x128xf32>
    %137 = arith.negf %136 : vector<2x128xf32>
    %138 = math.exp %137 : vector<2x128xf32>
    %cst_70 = arith.constant 1.000000e+00 : f32
    %139 = vector.broadcast %cst_70 : f32 to vector<2x128xf32>
    %140 = arith.addf %139, %138 : vector<2x128xf32>
    %141 = arith.divf %139, %140 : vector<2x128xf32>
    %142 = math.tanh %136 : vector<2x128xf32>
    %143 = vector.extract_strided_slice %141 {offsets = [0, 0], sizes = [2, 32], strides = [1, 1]} : vector<2x128xf32> to vector<2x32xf32>
    %144 = vector.extract_strided_slice %141 {offsets = [0, 32], sizes = [2, 32], strides = [1, 1]} : vector<2x128xf32> to vector<2x32xf32>
    %145 = vector.extract_strided_slice %142 {offsets = [0, 64], sizes = [2, 32], strides = [1, 1]} : vector<2x128xf32> to vector<2x32xf32>
    %146 = vector.extract_strided_slice %141 {offsets = [0, 96], sizes = [2, 32], strides = [1, 1]} : vector<2x128xf32> to vector<2x32xf32>
    %147 = arith.mulf %144, %129 : vector<2x32xf32>
    %148 = arith.mulf %143, %145 : vector<2x32xf32>
    %149 = arith.addf %147, %148 : vector<2x32xf32>
    %150 = math.tanh %149 : vector<2x32xf32>
    %151 = arith.mulf %146, %150 : vector<2x32xf32>
    %c2_71 = arith.constant 2 : index
    %c0_72 = arith.constant 0 : index
    %152 = vector.load %arg12[%c2_71, %c0_72] : memref<16x32xf32, #tpu.memory_space<vmem>>, vector<2x32xf32>
    tpu.vector_store %arg12[%c2_71, %c0_72], %151 {strides = array<i32>} : memref<16x32xf32, #tpu.memory_space<vmem>>, vector<2x32xf32>,
    %153 = vector.extract_strided_slice %108 {offsets = [4, 0], sizes = [2, 128], strides = [1, 1]} : vector<16x128xf32> to vector<2x128xf32>
    %154 = arith.truncf %151 : vector<2x32xf32> to vector<2x32xbf16>
    %cst_73 = arith.constant dense<0.000000e+00> : vector<2x128xf32>
    %155 = tpu.matmul %154, %102, %cst_73 {dimension_numbers = #tpu.dot_dimension_numbers<[1], [0], [0], [1], [0, 0, 1, 1], [], []>} : vector<2x32xbf16>, vector<32x128xbf16>, vector<2x128xf32> -> vector<2x128xf32>
    %156 = arith.addf %153, %155 : vector<2x128xf32>
    %157 = arith.negf %156 : vector<2x128xf32>
    %158 = math.exp %157 : vector<2x128xf32>
    %cst_74 = arith.constant 1.000000e+00 : f32
    %159 = vector.broadcast %cst_74 : f32 to vector<2x128xf32>
    %160 = arith.addf %159, %158 : vector<2x128xf32>
    %161 = arith.divf %159, %160 : vector<2x128xf32>
    %162 = math.tanh %156 : vector<2x128xf32>
    %163 = vector.extract_strided_slice %161 {offsets = [0, 0], sizes = [2, 32], strides = [1, 1]} : vector<2x128xf32> to vector<2x32xf32>
    %164 = vector.extract_strided_slice %161 {offsets = [0, 32], sizes = [2, 32], strides = [1, 1]} : vector<2x128xf32> to vector<2x32xf32>
    %165 = vector.extract_strided_slice %162 {offsets = [0, 64], sizes = [2, 32], strides = [1, 1]} : vector<2x128xf32> to vector<2x32xf32>
    %166 = vector.extract_strided_slice %161 {offsets = [0, 96], sizes = [2, 32], strides = [1, 1]} : vector<2x128xf32> to vector<2x32xf32>
    %167 = arith.mulf %164, %149 : vector<2x32xf32>
    %168 = arith.mulf %163, %165 : vector<2x32xf32>
    %169 = arith.addf %167, %168 : vector<2x32xf32>
    %170 = math.tanh %169 : vector<2x32xf32>
    %171 = arith.mulf %166, %170 : vector<2x32xf32>
    %c4_75 = arith.constant 4 : index
    %c0_76 = arith.constant 0 : index
    %172 = vector.load %arg12[%c4_75, %c0_76] : memref<16x32xf32, #tpu.memory_space<vmem>>, vector<2x32xf32>
    tpu.vector_store %arg12[%c4_75, %c0_76], %171 {strides = array<i32>} : memref<16x32xf32, #tpu.memory_space<vmem>>, vector<2x32xf32>,
    %173 = vector.extract_strided_slice %108 {offsets = [6, 0], sizes = [2, 128], strides = [1, 1]} : vector<16x128xf32> to vector<2x128xf32>
    %174 = arith.truncf %171 : vector<2x32xf32> to vector<2x32xbf16>
    %cst_77 = arith.constant dense<0.000000e+00> : vector<2x128xf32>
    %175 = tpu.matmul %174, %102, %cst_77 {dimension_numbers = #tpu.dot_dimension_numbers<[1], [0], [0], [1], [0, 0, 1, 1], [], []>} : vector<2x32xbf16>, vector<32x128xbf16>, vector<2x128xf32> -> vector<2x128xf32>
    %176 = arith.addf %173, %175 : vector<2x128xf32>
    %177 = arith.negf %176 : vector<2x128xf32>
    %178 = math.exp %177 : vector<2x128xf32>
    %cst_78 = arith.constant 1.000000e+00 : f32
    %179 = vector.broadcast %cst_78 : f32 to vector<2x128xf32>
    %180 = arith.addf %179, %178 : vector<2x128xf32>
    %181 = arith.divf %179, %180 : vector<2x128xf32>
    %182 = math.tanh %176 : vector<2x128xf32>
    %183 = vector.extract_strided_slice %181 {offsets = [0, 0], sizes = [2, 32], strides = [1, 1]} : vector<2x128xf32> to vector<2x32xf32>
    %184 = vector.extract_strided_slice %181 {offsets = [0, 32], sizes = [2, 32], strides = [1, 1]} : vector<2x128xf32> to vector<2x32xf32>
    %185 = vector.extract_strided_slice %182 {offsets = [0, 64], sizes = [2, 32], strides = [1, 1]} : vector<2x128xf32> to vector<2x32xf32>
    %186 = vector.extract_strided_slice %181 {offsets = [0, 96], sizes = [2, 32], strides = [1, 1]} : vector<2x128xf32> to vector<2x32xf32>
    %187 = arith.mulf %184, %169 : vector<2x32xf32>
    %188 = arith.mulf %183, %185 : vector<2x32xf32>
    %189 = arith.addf %187, %188 : vector<2x32xf32>
    %190 = math.tanh %189 : vector<2x32xf32>
    %191 = arith.mulf %186, %190 : vector<2x32xf32>
    %c6 = arith.constant 6 : index
    %c0_79 = arith.constant 0 : index
    %192 = vector.load %arg12[%c6, %c0_79] : memref<16x32xf32, #tpu.memory_space<vmem>>, vector<2x32xf32>
    tpu.vector_store %arg12[%c6, %c0_79], %191 {strides = array<i32>} : memref<16x32xf32, #tpu.memory_space<vmem>>, vector<2x32xf32>,
    %193 = vector.extract_strided_slice %108 {offsets = [8, 0], sizes = [2, 128], strides = [1, 1]} : vector<16x128xf32> to vector<2x128xf32>
    %194 = arith.truncf %191 : vector<2x32xf32> to vector<2x32xbf16>
    %cst_80 = arith.constant dense<0.000000e+00> : vector<2x128xf32>
    %195 = tpu.matmul %194, %102, %cst_80 {dimension_numbers = #tpu.dot_dimension_numbers<[1], [0], [0], [1], [0, 0, 1, 1], [], []>} : vector<2x32xbf16>, vector<32x128xbf16>, vector<2x128xf32> -> vector<2x128xf32>
    %196 = arith.addf %193, %195 : vector<2x128xf32>
    %197 = arith.negf %196 : vector<2x128xf32>
    %198 = math.exp %197 : vector<2x128xf32>
    %cst_81 = arith.constant 1.000000e+00 : f32
    %199 = vector.broadcast %cst_81 : f32 to vector<2x128xf32>
    %200 = arith.addf %199, %198 : vector<2x128xf32>
    %201 = arith.divf %199, %200 : vector<2x128xf32>
    %202 = math.tanh %196 : vector<2x128xf32>
    %203 = vector.extract_strided_slice %201 {offsets = [0, 0], sizes = [2, 32], strides = [1, 1]} : vector<2x128xf32> to vector<2x32xf32>
    %204 = vector.extract_strided_slice %201 {offsets = [0, 32], sizes = [2, 32], strides = [1, 1]} : vector<2x128xf32> to vector<2x32xf32>
    %205 = vector.extract_strided_slice %202 {offsets = [0, 64], sizes = [2, 32], strides = [1, 1]} : vector<2x128xf32> to vector<2x32xf32>
    %206 = vector.extract_strided_slice %201 {offsets = [0, 96], sizes = [2, 32], strides = [1, 1]} : vector<2x128xf32> to vector<2x32xf32>
    %207 = arith.mulf %204, %189 : vector<2x32xf32>
    %208 = arith.mulf %203, %205 : vector<2x32xf32>
    %209 = arith.addf %207, %208 : vector<2x32xf32>
    %210 = math.tanh %209 : vector<2x32xf32>
    %211 = arith.mulf %206, %210 : vector<2x32xf32>
    %c8 = arith.constant 8 : index
    %c0_82 = arith.constant 0 : index
    %212 = vector.load %arg12[%c8, %c0_82] : memref<16x32xf32, #tpu.memory_space<vmem>>, vector<2x32xf32>
    tpu.vector_store %arg12[%c8, %c0_82], %211 {strides = array<i32>} : memref<16x32xf32, #tpu.memory_space<vmem>>, vector<2x32xf32>,
    %213 = vector.extract_strided_slice %108 {offsets = [10, 0], sizes = [2, 128], strides = [1, 1]} : vector<16x128xf32> to vector<2x128xf32>
    %214 = arith.truncf %211 : vector<2x32xf32> to vector<2x32xbf16>
    %cst_83 = arith.constant dense<0.000000e+00> : vector<2x128xf32>
    %215 = tpu.matmul %214, %102, %cst_83 {dimension_numbers = #tpu.dot_dimension_numbers<[1], [0], [0], [1], [0, 0, 1, 1], [], []>} : vector<2x32xbf16>, vector<32x128xbf16>, vector<2x128xf32> -> vector<2x128xf32>
    %216 = arith.addf %213, %215 : vector<2x128xf32>
    %217 = arith.negf %216 : vector<2x128xf32>
    %218 = math.exp %217 : vector<2x128xf32>
    %cst_84 = arith.constant 1.000000e+00 : f32
    %219 = vector.broadcast %cst_84 : f32 to vector<2x128xf32>
    %220 = arith.addf %219, %218 : vector<2x128xf32>
    %221 = arith.divf %219, %220 : vector<2x128xf32>
    %222 = math.tanh %216 : vector<2x128xf32>
    %223 = vector.extract_strided_slice %221 {offsets = [0, 0], sizes = [2, 32], strides = [1, 1]} : vector<2x128xf32> to vector<2x32xf32>
    %224 = vector.extract_strided_slice %221 {offsets = [0, 32], sizes = [2, 32], strides = [1, 1]} : vector<2x128xf32> to vector<2x32xf32>
    %225 = vector.extract_strided_slice %222 {offsets = [0, 64], sizes = [2, 32], strides = [1, 1]} : vector<2x128xf32> to vector<2x32xf32>
    %226 = vector.extract_strided_slice %221 {offsets = [0, 96], sizes = [2, 32], strides = [1, 1]} : vector<2x128xf32> to vector<2x32xf32>
    %227 = arith.mulf %224, %209 : vector<2x32xf32>
    %228 = arith.mulf %223, %225 : vector<2x32xf32>
    %229 = arith.addf %227, %228 : vector<2x32xf32>
    %230 = math.tanh %229 : vector<2x32xf32>
    %231 = arith.mulf %226, %230 : vector<2x32xf32>
    %c10 = arith.constant 10 : index
    %c0_85 = arith.constant 0 : index
    %232 = vector.load %arg12[%c10, %c0_85] : memref<16x32xf32, #tpu.memory_space<vmem>>, vector<2x32xf32>
    tpu.vector_store %arg12[%c10, %c0_85], %231 {strides = array<i32>} : memref<16x32xf32, #tpu.memory_space<vmem>>, vector<2x32xf32>,
    %233 = vector.extract_strided_slice %108 {offsets = [12, 0], sizes = [2, 128], strides = [1, 1]} : vector<16x128xf32> to vector<2x128xf32>
    %234 = arith.truncf %231 : vector<2x32xf32> to vector<2x32xbf16>
    %cst_86 = arith.constant dense<0.000000e+00> : vector<2x128xf32>
    %235 = tpu.matmul %234, %102, %cst_86 {dimension_numbers = #tpu.dot_dimension_numbers<[1], [0], [0], [1], [0, 0, 1, 1], [], []>} : vector<2x32xbf16>, vector<32x128xbf16>, vector<2x128xf32> -> vector<2x128xf32>
    %236 = arith.addf %233, %235 : vector<2x128xf32>
    %237 = arith.negf %236 : vector<2x128xf32>
    %238 = math.exp %237 : vector<2x128xf32>
    %cst_87 = arith.constant 1.000000e+00 : f32
    %239 = vector.broadcast %cst_87 : f32 to vector<2x128xf32>
    %240 = arith.addf %239, %238 : vector<2x128xf32>
    %241 = arith.divf %239, %240 : vector<2x128xf32>
    %242 = math.tanh %236 : vector<2x128xf32>
    %243 = vector.extract_strided_slice %241 {offsets = [0, 0], sizes = [2, 32], strides = [1, 1]} : vector<2x128xf32> to vector<2x32xf32>
    %244 = vector.extract_strided_slice %241 {offsets = [0, 32], sizes = [2, 32], strides = [1, 1]} : vector<2x128xf32> to vector<2x32xf32>
    %245 = vector.extract_strided_slice %242 {offsets = [0, 64], sizes = [2, 32], strides = [1, 1]} : vector<2x128xf32> to vector<2x32xf32>
    %246 = vector.extract_strided_slice %241 {offsets = [0, 96], sizes = [2, 32], strides = [1, 1]} : vector<2x128xf32> to vector<2x32xf32>
    %247 = arith.mulf %244, %229 : vector<2x32xf32>
    %248 = arith.mulf %243, %245 : vector<2x32xf32>
    %249 = arith.addf %247, %248 : vector<2x32xf32>
    %250 = math.tanh %249 : vector<2x32xf32>
    %251 = arith.mulf %246, %250 : vector<2x32xf32>
    %c12 = arith.constant 12 : index
    %c0_88 = arith.constant 0 : index
    %252 = vector.load %arg12[%c12, %c0_88] : memref<16x32xf32, #tpu.memory_space<vmem>>, vector<2x32xf32>
    tpu.vector_store %arg12[%c12, %c0_88], %251 {strides = array<i32>} : memref<16x32xf32, #tpu.memory_space<vmem>>, vector<2x32xf32>,
    %253 = vector.extract_strided_slice %108 {offsets = [14, 0], sizes = [2, 128], strides = [1, 1]} : vector<16x128xf32> to vector<2x128xf32>
    %254 = arith.truncf %251 : vector<2x32xf32> to vector<2x32xbf16>
    %cst_89 = arith.constant dense<0.000000e+00> : vector<2x128xf32>
    %255 = tpu.matmul %254, %102, %cst_89 {dimension_numbers = #tpu.dot_dimension_numbers<[1], [0], [0], [1], [0, 0, 1, 1], [], []>} : vector<2x32xbf16>, vector<32x128xbf16>, vector<2x128xf32> -> vector<2x128xf32>
    %256 = arith.addf %253, %255 : vector<2x128xf32>
    %257 = arith.negf %256 : vector<2x128xf32>
    %258 = math.exp %257 : vector<2x128xf32>
    %cst_90 = arith.constant 1.000000e+00 : f32
    %259 = vector.broadcast %cst_90 : f32 to vector<2x128xf32>
    %260 = arith.addf %259, %258 : vector<2x128xf32>
    %261 = arith.divf %259, %260 : vector<2x128xf32>
    %262 = math.tanh %256 : vector<2x128xf32>
    %263 = vector.extract_strided_slice %261 {offsets = [0, 0], sizes = [2, 32], strides = [1, 1]} : vector<2x128xf32> to vector<2x32xf32>
    %264 = vector.extract_strided_slice %261 {offsets = [0, 32], sizes = [2, 32], strides = [1, 1]} : vector<2x128xf32> to vector<2x32xf32>
    %265 = vector.extract_strided_slice %262 {offsets = [0, 64], sizes = [2, 32], strides = [1, 1]} : vector<2x128xf32> to vector<2x32xf32>
    %266 = vector.extract_strided_slice %261 {offsets = [0, 96], sizes = [2, 32], strides = [1, 1]} : vector<2x128xf32> to vector<2x32xf32>
    %267 = arith.mulf %264, %249 : vector<2x32xf32>
    %268 = arith.mulf %263, %265 : vector<2x32xf32>
    %269 = arith.addf %267, %268 : vector<2x32xf32>
    %270 = math.tanh %269 : vector<2x32xf32>
    %271 = arith.mulf %266, %270 : vector<2x32xf32>
    %c14 = arith.constant 14 : index
    %c0_91 = arith.constant 0 : index
    %272 = vector.load %arg12[%c14, %c0_91] : memref<16x32xf32, #tpu.memory_space<vmem>>, vector<2x32xf32>
    tpu.vector_store %arg12[%c14, %c0_91], %271 {strides = array<i32>} : memref<16x32xf32, #tpu.memory_space<vmem>>, vector<2x32xf32>,
    %c0_92 = arith.constant 0 : index
    %c0_93 = arith.constant 0 : index
    %273 = vector.load %arg12[%c0_92, %c0_93] : memref<16x32xf32, #tpu.memory_space<vmem>>, vector<16x32xf32>
    %c1_94 = arith.constant 1 : index
    %c0_95 = arith.constant 0 : index
    %c0_96 = arith.constant 0 : index
    %274 = vector.load %arg4[%c1_94, %c0_95, %c0_96] : memref<2x32x128xbf16, #tpu.memory_space<vmem>>, vector<1x32x128xbf16>
    %275 = vector.shape_cast %274 : vector<1x32x128xbf16> to vector<32x128xbf16>
    %c1_97 = arith.constant 1 : index
    %c0_98 = arith.constant 0 : index
    %c0_99 = arith.constant 0 : index
    %276 = vector.load %arg5[%c1_97, %c0_98, %c0_99] : memref<2x32x128xbf16, #tpu.memory_space<vmem>>, vector<1x32x128xbf16>
    %277 = vector.shape_cast %276 : vector<1x32x128xbf16> to vector<32x128xbf16>
    %c1_100 = arith.constant 1 : index
    %c0_101 = arith.constant 0 : index
    %c0_102 = arith.constant 0 : index
    %278 = vector.load %arg6[%c1_100, %c0_101, %c0_102] : memref<2x1x128xf32, #tpu.memory_space<vmem>>, vector<1x1x128xf32>
    %279 = vector.shape_cast %278 : vector<1x1x128xf32> to vector<1x128xf32>
    %280 = arith.truncf %273 : vector<16x32xf32> to vector<16x32xbf16>
    %cst_103 = arith.constant dense<0.000000e+00> : vector<16x128xf32>
    %281 = tpu.matmul %280, %275, %cst_103 {dimension_numbers = #tpu.dot_dimension_numbers<[1], [0], [0], [1], [0, 0, 1, 1], [], []>} : vector<16x32xbf16>, vector<32x128xbf16>, vector<16x128xf32> -> vector<16x128xf32>
    %282 = vector.broadcast %279 : vector<1x128xf32> to vector<16x128xf32>
    %283 = arith.addf %281, %282 : vector<16x128xf32>
    %c1_104 = arith.constant 1 : index
    %c0_105 = arith.constant 0 : index
    %c0_106 = arith.constant 0 : index
    %284 = vector.load %arg7[%c1_104, %c0_105, %c0_106] : memref<2x2x32xf32, #tpu.memory_space<vmem>>, vector<1x2x32xf32>
    %285 = vector.shape_cast %284 : vector<1x2x32xf32> to vector<2x32xf32>
    %c1_107 = arith.constant 1 : index
    %c0_108 = arith.constant 0 : index
    %c0_109 = arith.constant 0 : index
    %286 = vector.load %arg8[%c1_107, %c0_108, %c0_109] : memref<2x2x32xf32, #tpu.memory_space<vmem>>, vector<1x2x32xf32>
    %287 = vector.shape_cast %286 : vector<1x2x32xf32> to vector<2x32xf32>
    %288 = vector.extract_strided_slice %283 {offsets = [0, 0], sizes = [2, 128], strides = [1, 1]} : vector<16x128xf32> to vector<2x128xf32>
    %289 = arith.truncf %285 : vector<2x32xf32> to vector<2x32xbf16>
    %cst_110 = arith.constant dense<0.000000e+00> : vector<2x128xf32>
    %290 = tpu.matmul %289, %277, %cst_110 {dimension_numbers = #tpu.dot_dimension_numbers<[1], [0], [0], [1], [0, 0, 1, 1], [], []>} : vector<2x32xbf16>, vector<32x128xbf16>, vector<2x128xf32> -> vector<2x128xf32>
    %291 = arith.addf %288, %290 : vector<2x128xf32>
    %292 = arith.negf %291 : vector<2x128xf32>
    %293 = math.exp %292 : vector<2x128xf32>
    %cst_111 = arith.constant 1.000000e+00 : f32
    %294 = vector.broadcast %cst_111 : f32 to vector<2x128xf32>
    %295 = arith.addf %294, %293 : vector<2x128xf32>
    %296 = arith.divf %294, %295 : vector<2x128xf32>
    %297 = math.tanh %291 : vector<2x128xf32>
    %298 = vector.extract_strided_slice %296 {offsets = [0, 0], sizes = [2, 32], strides = [1, 1]} : vector<2x128xf32> to vector<2x32xf32>
    %299 = vector.extract_strided_slice %296 {offsets = [0, 32], sizes = [2, 32], strides = [1, 1]} : vector<2x128xf32> to vector<2x32xf32>
    %300 = vector.extract_strided_slice %297 {offsets = [0, 64], sizes = [2, 32], strides = [1, 1]} : vector<2x128xf32> to vector<2x32xf32>
    %301 = vector.extract_strided_slice %296 {offsets = [0, 96], sizes = [2, 32], strides = [1, 1]} : vector<2x128xf32> to vector<2x32xf32>
    %302 = arith.mulf %299, %287 : vector<2x32xf32>
    %303 = arith.mulf %298, %300 : vector<2x32xf32>
    %304 = arith.addf %302, %303 : vector<2x32xf32>
    %305 = math.tanh %304 : vector<2x32xf32>
    %306 = arith.mulf %301, %305 : vector<2x32xf32>
    %307 = vector.extract_strided_slice %283 {offsets = [2, 0], sizes = [2, 128], strides = [1, 1]} : vector<16x128xf32> to vector<2x128xf32>
    %308 = arith.truncf %306 : vector<2x32xf32> to vector<2x32xbf16>
    %cst_112 = arith.constant dense<0.000000e+00> : vector<2x128xf32>
    %309 = tpu.matmul %308, %277, %cst_112 {dimension_numbers = #tpu.dot_dimension_numbers<[1], [0], [0], [1], [0, 0, 1, 1], [], []>} : vector<2x32xbf16>, vector<32x128xbf16>, vector<2x128xf32> -> vector<2x128xf32>
    %310 = arith.addf %307, %309 : vector<2x128xf32>
    %311 = arith.negf %310 : vector<2x128xf32>
    %312 = math.exp %311 : vector<2x128xf32>
    %cst_113 = arith.constant 1.000000e+00 : f32
    %313 = vector.broadcast %cst_113 : f32 to vector<2x128xf32>
    %314 = arith.addf %313, %312 : vector<2x128xf32>
    %315 = arith.divf %313, %314 : vector<2x128xf32>
    %316 = math.tanh %310 : vector<2x128xf32>
    %317 = vector.extract_strided_slice %315 {offsets = [0, 0], sizes = [2, 32], strides = [1, 1]} : vector<2x128xf32> to vector<2x32xf32>
    %318 = vector.extract_strided_slice %315 {offsets = [0, 32], sizes = [2, 32], strides = [1, 1]} : vector<2x128xf32> to vector<2x32xf32>
    %319 = vector.extract_strided_slice %316 {offsets = [0, 64], sizes = [2, 32], strides = [1, 1]} : vector<2x128xf32> to vector<2x32xf32>
    %320 = vector.extract_strided_slice %315 {offsets = [0, 96], sizes = [2, 32], strides = [1, 1]} : vector<2x128xf32> to vector<2x32xf32>
    %321 = arith.mulf %318, %304 : vector<2x32xf32>
    %322 = arith.mulf %317, %319 : vector<2x32xf32>
    %323 = arith.addf %321, %322 : vector<2x32xf32>
    %324 = math.tanh %323 : vector<2x32xf32>
    %325 = arith.mulf %320, %324 : vector<2x32xf32>
    %326 = arith.maximumf %306, %325 : vector<2x32xf32>
    %327 = vector.extract_strided_slice %283 {offsets = [4, 0], sizes = [2, 128], strides = [1, 1]} : vector<16x128xf32> to vector<2x128xf32>
    %328 = arith.truncf %325 : vector<2x32xf32> to vector<2x32xbf16>
    %cst_114 = arith.constant dense<0.000000e+00> : vector<2x128xf32>
    %329 = tpu.matmul %328, %277, %cst_114 {dimension_numbers = #tpu.dot_dimension_numbers<[1], [0], [0], [1], [0, 0, 1, 1], [], []>} : vector<2x32xbf16>, vector<32x128xbf16>, vector<2x128xf32> -> vector<2x128xf32>
    %330 = arith.addf %327, %329 : vector<2x128xf32>
    %331 = arith.negf %330 : vector<2x128xf32>
    %332 = math.exp %331 : vector<2x128xf32>
    %cst_115 = arith.constant 1.000000e+00 : f32
    %333 = vector.broadcast %cst_115 : f32 to vector<2x128xf32>
    %334 = arith.addf %333, %332 : vector<2x128xf32>
    %335 = arith.divf %333, %334 : vector<2x128xf32>
    %336 = math.tanh %330 : vector<2x128xf32>
    %337 = vector.extract_strided_slice %335 {offsets = [0, 0], sizes = [2, 32], strides = [1, 1]} : vector<2x128xf32> to vector<2x32xf32>
    %338 = vector.extract_strided_slice %335 {offsets = [0, 32], sizes = [2, 32], strides = [1, 1]} : vector<2x128xf32> to vector<2x32xf32>
    %339 = vector.extract_strided_slice %336 {offsets = [0, 64], sizes = [2, 32], strides = [1, 1]} : vector<2x128xf32> to vector<2x32xf32>
    %340 = vector.extract_strided_slice %335 {offsets = [0, 96], sizes = [2, 32], strides = [1, 1]} : vector<2x128xf32> to vector<2x32xf32>
    %341 = arith.mulf %338, %323 : vector<2x32xf32>
    %342 = arith.mulf %337, %339 : vector<2x32xf32>
    %343 = arith.addf %341, %342 : vector<2x32xf32>
    %344 = math.tanh %343 : vector<2x32xf32>
    %345 = arith.mulf %340, %344 : vector<2x32xf32>
    %346 = arith.maximumf %326, %345 : vector<2x32xf32>
    %347 = vector.extract_strided_slice %283 {offsets = [6, 0], sizes = [2, 128], strides = [1, 1]} : vector<16x128xf32> to vector<2x128xf32>
    %348 = arith.truncf %345 : vector<2x32xf32> to vector<2x32xbf16>
    %cst_116 = arith.constant dense<0.000000e+00> : vector<2x128xf32>
    %349 = tpu.matmul %348, %277, %cst_116 {dimension_numbers = #tpu.dot_dimension_numbers<[1], [0], [0], [1], [0, 0, 1, 1], [], []>} : vector<2x32xbf16>, vector<32x128xbf16>, vector<2x128xf32> -> vector<2x128xf32>
    %350 = arith.addf %347, %349 : vector<2x128xf32>
    %351 = arith.negf %350 : vector<2x128xf32>
    %352 = math.exp %351 : vector<2x128xf32>
    %cst_117 = arith.constant 1.000000e+00 : f32
    %353 = vector.broadcast %cst_117 : f32 to vector<2x128xf32>
    %354 = arith.addf %353, %352 : vector<2x128xf32>
    %355 = arith.divf %353, %354 : vector<2x128xf32>
    %356 = math.tanh %350 : vector<2x128xf32>
    %357 = vector.extract_strided_slice %355 {offsets = [0, 0], sizes = [2, 32], strides = [1, 1]} : vector<2x128xf32> to vector<2x32xf32>
    %358 = vector.extract_strided_slice %355 {offsets = [0, 32], sizes = [2, 32], strides = [1, 1]} : vector<2x128xf32> to vector<2x32xf32>
    %359 = vector.extract_strided_slice %356 {offsets = [0, 64], sizes = [2, 32], strides = [1, 1]} : vector<2x128xf32> to vector<2x32xf32>
    %360 = vector.extract_strided_slice %355 {offsets = [0, 96], sizes = [2, 32], strides = [1, 1]} : vector<2x128xf32> to vector<2x32xf32>
    %361 = arith.mulf %358, %343 : vector<2x32xf32>
    %362 = arith.mulf %357, %359 : vector<2x32xf32>
    %363 = arith.addf %361, %362 : vector<2x32xf32>
    %364 = math.tanh %363 : vector<2x32xf32>
    %365 = arith.mulf %360, %364 : vector<2x32xf32>
    %366 = arith.maximumf %346, %365 : vector<2x32xf32>
    %367 = vector.extract_strided_slice %283 {offsets = [8, 0], sizes = [2, 128], strides = [1, 1]} : vector<16x128xf32> to vector<2x128xf32>
    %368 = arith.truncf %365 : vector<2x32xf32> to vector<2x32xbf16>
    %cst_118 = arith.constant dense<0.000000e+00> : vector<2x128xf32>
    %369 = tpu.matmul %368, %277, %cst_118 {dimension_numbers = #tpu.dot_dimension_numbers<[1], [0], [0], [1], [0, 0, 1, 1], [], []>} : vector<2x32xbf16>, vector<32x128xbf16>, vector<2x128xf32> -> vector<2x128xf32>
    %370 = arith.addf %367, %369 : vector<2x128xf32>
    %371 = arith.negf %370 : vector<2x128xf32>
    %372 = math.exp %371 : vector<2x128xf32>
    %cst_119 = arith.constant 1.000000e+00 : f32
    %373 = vector.broadcast %cst_119 : f32 to vector<2x128xf32>
    %374 = arith.addf %373, %372 : vector<2x128xf32>
    %375 = arith.divf %373, %374 : vector<2x128xf32>
    %376 = math.tanh %370 : vector<2x128xf32>
    %377 = vector.extract_strided_slice %375 {offsets = [0, 0], sizes = [2, 32], strides = [1, 1]} : vector<2x128xf32> to vector<2x32xf32>
    %378 = vector.extract_strided_slice %375 {offsets = [0, 32], sizes = [2, 32], strides = [1, 1]} : vector<2x128xf32> to vector<2x32xf32>
    %379 = vector.extract_strided_slice %376 {offsets = [0, 64], sizes = [2, 32], strides = [1, 1]} : vector<2x128xf32> to vector<2x32xf32>
    %380 = vector.extract_strided_slice %375 {offsets = [0, 96], sizes = [2, 32], strides = [1, 1]} : vector<2x128xf32> to vector<2x32xf32>
    %381 = arith.mulf %378, %363 : vector<2x32xf32>
    %382 = arith.mulf %377, %379 : vector<2x32xf32>
    %383 = arith.addf %381, %382 : vector<2x32xf32>
    %384 = math.tanh %383 : vector<2x32xf32>
    %385 = arith.mulf %380, %384 : vector<2x32xf32>
    %386 = arith.maximumf %366, %385 : vector<2x32xf32>
    %387 = vector.extract_strided_slice %283 {offsets = [10, 0], sizes = [2, 128], strides = [1, 1]} : vector<16x128xf32> to vector<2x128xf32>
    %388 = arith.truncf %385 : vector<2x32xf32> to vector<2x32xbf16>
    %cst_120 = arith.constant dense<0.000000e+00> : vector<2x128xf32>
    %389 = tpu.matmul %388, %277, %cst_120 {dimension_numbers = #tpu.dot_dimension_numbers<[1], [0], [0], [1], [0, 0, 1, 1], [], []>} : vector<2x32xbf16>, vector<32x128xbf16>, vector<2x128xf32> -> vector<2x128xf32>
    %390 = arith.addf %387, %389 : vector<2x128xf32>
    %391 = arith.negf %390 : vector<2x128xf32>
    %392 = math.exp %391 : vector<2x128xf32>
    %cst_121 = arith.constant 1.000000e+00 : f32
    %393 = vector.broadcast %cst_121 : f32 to vector<2x128xf32>
    %394 = arith.addf %393, %392 : vector<2x128xf32>
    %395 = arith.divf %393, %394 : vector<2x128xf32>
    %396 = math.tanh %390 : vector<2x128xf32>
    %397 = vector.extract_strided_slice %395 {offsets = [0, 0], sizes = [2, 32], strides = [1, 1]} : vector<2x128xf32> to vector<2x32xf32>
    %398 = vector.extract_strided_slice %395 {offsets = [0, 32], sizes = [2, 32], strides = [1, 1]} : vector<2x128xf32> to vector<2x32xf32>
    %399 = vector.extract_strided_slice %396 {offsets = [0, 64], sizes = [2, 32], strides = [1, 1]} : vector<2x128xf32> to vector<2x32xf32>
    %400 = vector.extract_strided_slice %395 {offsets = [0, 96], sizes = [2, 32], strides = [1, 1]} : vector<2x128xf32> to vector<2x32xf32>
    %401 = arith.mulf %398, %383 : vector<2x32xf32>
    %402 = arith.mulf %397, %399 : vector<2x32xf32>
    %403 = arith.addf %401, %402 : vector<2x32xf32>
    %404 = math.tanh %403 : vector<2x32xf32>
    %405 = arith.mulf %400, %404 : vector<2x32xf32>
    %406 = arith.maximumf %386, %405 : vector<2x32xf32>
    %407 = vector.extract_strided_slice %283 {offsets = [12, 0], sizes = [2, 128], strides = [1, 1]} : vector<16x128xf32> to vector<2x128xf32>
    %408 = arith.truncf %405 : vector<2x32xf32> to vector<2x32xbf16>
    %cst_122 = arith.constant dense<0.000000e+00> : vector<2x128xf32>
    %409 = tpu.matmul %408, %277, %cst_122 {dimension_numbers = #tpu.dot_dimension_numbers<[1], [0], [0], [1], [0, 0, 1, 1], [], []>} : vector<2x32xbf16>, vector<32x128xbf16>, vector<2x128xf32> -> vector<2x128xf32>
    %410 = arith.addf %407, %409 : vector<2x128xf32>
    %411 = arith.negf %410 : vector<2x128xf32>
    %412 = math.exp %411 : vector<2x128xf32>
    %cst_123 = arith.constant 1.000000e+00 : f32
    %413 = vector.broadcast %cst_123 : f32 to vector<2x128xf32>
    %414 = arith.addf %413, %412 : vector<2x128xf32>
    %415 = arith.divf %413, %414 : vector<2x128xf32>
    %416 = math.tanh %410 : vector<2x128xf32>
    %417 = vector.extract_strided_slice %415 {offsets = [0, 0], sizes = [2, 32], strides = [1, 1]} : vector<2x128xf32> to vector<2x32xf32>
    %418 = vector.extract_strided_slice %415 {offsets = [0, 32], sizes = [2, 32], strides = [1, 1]} : vector<2x128xf32> to vector<2x32xf32>
    %419 = vector.extract_strided_slice %416 {offsets = [0, 64], sizes = [2, 32], strides = [1, 1]} : vector<2x128xf32> to vector<2x32xf32>
    %420 = vector.extract_strided_slice %415 {offsets = [0, 96], sizes = [2, 32], strides = [1, 1]} : vector<2x128xf32> to vector<2x32xf32>
    %421 = arith.mulf %418, %403 : vector<2x32xf32>
    %422 = arith.mulf %417, %419 : vector<2x32xf32>
    %423 = arith.addf %421, %422 : vector<2x32xf32>
    %424 = math.tanh %423 : vector<2x32xf32>
    %425 = arith.mulf %420, %424 : vector<2x32xf32>
    %426 = arith.maximumf %406, %425 : vector<2x32xf32>
    %427 = vector.extract_strided_slice %283 {offsets = [14, 0], sizes = [2, 128], strides = [1, 1]} : vector<16x128xf32> to vector<2x128xf32>
    %428 = arith.truncf %425 : vector<2x32xf32> to vector<2x32xbf16>
    %cst_124 = arith.constant dense<0.000000e+00> : vector<2x128xf32>
    %429 = tpu.matmul %428, %277, %cst_124 {dimension_numbers = #tpu.dot_dimension_numbers<[1], [0], [0], [1], [0, 0, 1, 1], [], []>} : vector<2x32xbf16>, vector<32x128xbf16>, vector<2x128xf32> -> vector<2x128xf32>
    %430 = arith.addf %427, %429 : vector<2x128xf32>
    %431 = arith.negf %430 : vector<2x128xf32>
    %432 = math.exp %431 : vector<2x128xf32>
    %cst_125 = arith.constant 1.000000e+00 : f32
    %433 = vector.broadcast %cst_125 : f32 to vector<2x128xf32>
    %434 = arith.addf %433, %432 : vector<2x128xf32>
    %435 = arith.divf %433, %434 : vector<2x128xf32>
    %436 = math.tanh %430 : vector<2x128xf32>
    %437 = vector.extract_strided_slice %435 {offsets = [0, 0], sizes = [2, 32], strides = [1, 1]} : vector<2x128xf32> to vector<2x32xf32>
    %438 = vector.extract_strided_slice %435 {offsets = [0, 32], sizes = [2, 32], strides = [1, 1]} : vector<2x128xf32> to vector<2x32xf32>
    %439 = vector.extract_strided_slice %436 {offsets = [0, 64], sizes = [2, 32], strides = [1, 1]} : vector<2x128xf32> to vector<2x32xf32>
    %440 = vector.extract_strided_slice %435 {offsets = [0, 96], sizes = [2, 32], strides = [1, 1]} : vector<2x128xf32> to vector<2x32xf32>
    %441 = arith.mulf %438, %423 : vector<2x32xf32>
    %442 = arith.mulf %437, %439 : vector<2x32xf32>
    %443 = arith.addf %441, %442 : vector<2x32xf32>
    %444 = math.tanh %443 : vector<2x32xf32>
    %445 = arith.mulf %440, %444 : vector<2x32xf32>
    %446 = arith.maximumf %426, %445 : vector<2x32xf32>
    %447 = arith.truncf %446 : vector<2x32xf32> to vector<2x32xbf16>
    %c0_126 = arith.constant 0 : index
    %c0_127 = arith.constant 0 : index
    %448 = vector.load %arg9[%c0_126, %c0_127] : memref<32x10xbf16, #tpu.memory_space<vmem>>, vector<32x10xbf16>
    %cst_128 = arith.constant dense<0.000000e+00> : vector<2x10xf32>
    %449 = tpu.matmul %447, %448, %cst_128 {dimension_numbers = #tpu.dot_dimension_numbers<[1], [0], [0], [1], [0, 0, 1, 1], [], []>} : vector<2x32xbf16>, vector<32x10xbf16>, vector<2x10xf32> -> vector<2x10xf32>
    %c0_129 = arith.constant 0 : index
    %c0_130 = arith.constant 0 : index
    %450 = vector.load %arg10[%c0_129, %c0_130] : memref<1x10xf32, #tpu.memory_space<vmem>>, vector<1x10xf32>
    %451 = vector.broadcast %450 : vector<1x10xf32> to vector<2x10xf32>
    %452 = arith.addf %449, %451 : vector<2x10xf32>
    %c0_131 = arith.constant 0 : index
    %c0_132 = arith.constant 0 : index
    %453 = vector.load %arg11[%c0_131, %c0_132] : memref<2x10xf32, #tpu.memory_space<vmem>>, vector<2x10xf32>
    tpu.vector_store %arg11[%c0_131, %c0_132], %452 {strides = array<i32>} : memref<2x10xf32, #tpu.memory_space<vmem>>, vector<2x10xf32>,
    return
  }
}

</mosaic_0001>

<bundles_post_ra>
// kernel: audio_lstm_forward.1
= control target key start
LH: loop header
LB: loop body
LE: loop exit
PB: predicated region body
PF: predicated region fallthrough
CT: control target
= control target key end

     0   :  { %v3326_v1 = vmov 0.0   ;;  %vm85_vm0 = vcmask 130048   ;;  %vm3327_vm1 = vmmov 0   ;;  %vm286_vm2 = vcmask 1046528   ;;  %s3898_s0 = inlined_call_operand.vmem [shape: f32[4,18,16], index: 0, kind: input, shape index: {}]   ;;  %s3899_s1 = inlined_call_operand.vmem [shape: bf16[5,16,32], index: 1, kind: input, shape index: {}]   ;;  %s3900_s2 = inlined_call_operand.vmem [shape: f32[1,32], index: 2, kind: input, shape index: {}]   ;;  %s3901_s3 = inlined_call_operand.vmem [shape: f32[1,32], index: 3, kind: input, shape index: {}]   ;;  %s3902_s4 = inlined_call_operand.vmem [shape: bf16[2,32,128], index: 4, kind: input, shape index: {}]   ;;  %s3903_s5 = inlined_call_operand.vmem [shape: bf16[2,32,128], index: 5, kind: input, shape index: {}]   ;;  %s3904_s6 = inlined_call_operand.vmem [shape: f32[2,1,128], index: 6, kind: input, shape index: {}]   ;;  %s3905_s7 = inlined_call_operand.vmem [shape: f32[2,2,32], index: 7, kind: input, shape index: {}]   ;;  %s3906_s8 = inlined_call_operand.vmem [shape: f32[2,2,32], index: 8, kind: input, shape index: {}]   ;;  %s3907_s9 = inlined_call_operand.vmem [shape: bf16[32,10], index: 9, kind: input, shape index: {}]   ;;  %s3908_s10 = inlined_call_operand.vmem [shape: f32[1,10], index: 10, kind: input, shape index: {}]   ;;  %s3909_s11 = inlined_call_operand.hbm [shape: f32[2,10], index: 11, kind: output, shape index: {}]  }
   0x1   :  { %v3394_v0 = vld [vmem:[%s3899_s1 + $0x8] sm:$0xff]   ;;  %2818 = vmatprep.subr.bf16.mxu0 %v3326_v1  ;;  %2848 = vmatprep.subr.bf16.mxu1 %v3326_v1  ;;  %v2618_v2 = vld [vmem:[%s3898_s0 + $0x18] sm:$0xff]  ;;  %v2619_v3 = vld [vmem:[%s3898_s0 + $0x20] sm:$0xff] }
   0x2   :  { %v2621_v4 = vld [vmem:[%s3898_s0 + $0x30] sm:$0xff]  ;;  %2819 = vmatpush3.bf16.msra.mxu0 %v3394_v0  ;;  %2849 = vmatpush3.bf16.msra.mxu1 %v3394_v0  ;;  %v3409_v5 = vpack.c.bf16 %v2619_v3, %v2618_v2  ;;  %v2622_v6 = vld [vmem:[%s3898_s0 + $0x38] sm:$0xff]  ;;  %v3423_v8 = vld [vmem:[%s3899_s1] sm:$0xff]  }
   0x3   :  { %2820 = vmatprep.mubr.msk.bf16.mxu0 %vm3327_vm1, %v3326_v1  ;;  %2850 = vmatprep.mubr.msk.bf16.mxu1 %vm3327_vm1, %v3326_v1  ;;  %v3418_v7 = vpack.c.bf16 %v2622_v6, %v2621_v4  ;;  %v2624_v9 = vld [vmem:[%s3898_s0 + $0x48] sm:$0xff]  ;;  %v2625_v10 = vld [vmem:[%s3898_s0 + $0x50] sm:$0xff]  ;;  %v2626_v12 = vld [vmem:[%s3898_s0 + $0x58] sm:$0x3] }
   0x4   :  { %2824 = vmatprep.subr.bf16.mxu0 %v3326_v1  ;;  %2854 = vmatprep.subr.bf16.mxu1 %v3326_v1  ;;  %v3445_v11 = vpack.c.bf16 %v2625_v10, %v2624_v9  ;;  %v42_v13 = vld [vmem:[%s3898_s0] sm:$0xff]  ;;  %v64_v14 = vpack.c.bf16 %v2626_v12, %v2626_v12  ;;  %v43_v15 = vld [vmem:[%s3898_s0 + $0x8] sm:$0xff]  ;;  %v3161_v18 = vld [vmem:[%s3899_s1 + $0x10] sm:$0xff]  }
   0x5   :  { %2821 = vmatmul.mubr.msk.bf16.vlgmr.msra.gmra.mrb[0].mxu0 %vm85_vm0, %v3409_v5  ;;  %2851 = vmatmul.mubr.msk.bf16.vlgmr.msra.gmra.mrb[0].mxu1 %vm85_vm0, %v3418_v7  ;;  %v57_v19 = vpack.c.bf16 %v43_v15, %v42_v13 }
   0x6   :  { %2825 = vmatpush3.bf16.msra.mxu0 %v3423_v8  ;;  %2855 = vmatpush3.bf16.msra.mxu1 %v3423_v8  ;;  %v984_v16 = vrot.slane %v3445_v11, 1  ;;  %v985_v17 = vrot.slane %v64_v14, 1 }
   0x7   :  { %2826 = vmatprep.mubr.msk.bf16.mxu0 %vm3327_vm1, %v3326_v1  ;;  %2856 = vmatprep.mubr.msk.bf16.mxu1 %vm3327_vm1, %v3326_v1 }
   0x8   :  { %2830 = vmatprep.subr.bf16.mxu0 %v3326_v1  ;;  %2860 = vmatprep.subr.bf16.mxu1 %v3326_v1  ;;  %v3461_v20 = vsel %vm286_vm2, %v984_v16, %v985_v17 }
  0x11   :  { %2827 = vmatmul.mubr.msk.bf16.vlgmr.msra.gmra.mrb[0].mxu0 %vm85_vm0, %v57_v19  ;;  %2857 = vmatmul.mubr.msk.bf16.vlgmr.msra.gmra.mrb[0].mxu1 %vm85_vm0, %v3409_v5 }
  0x12   :  { %16 = vsyncpa [#allocation4], 0  ;;  %2831 = vmatpush3.bf16.msra.mxu0 %v3161_v18  ;;  %2861 = vmatpush3.bf16.msra.mxu1 %v3161_v18  ;;  %v3162_v21 = vld [vmem:[%s3899_s1 + $0x18] sm:$0xff]   ;;  %v44_v22 = vld [vmem:[%s3898_s0 + $0x10] sm:$0x3]  ;;  %v287_v24 = vrot.slane %v57_v19, 1 }
  0x13   :  { %2832 = vmatprep.mubr.msk.bf16.mxu0 %vm3327_vm1, %v3326_v1  ;;  %2862 = vmatprep.mubr.msk.bf16.mxu1 %vm3327_vm1, %v3326_v1  ;;  %v58_v23 = vpack.c.bf16 %v44_v22, %v44_v22  ;;  %v3163_v27 = vld [vmem:[%s3899_s1 + $0x20] sm:$0xff]   ;;  %v2620_v28 = vld [vmem:[%s3898_s0 + $0x28] sm:$0x3]  ;;  %v530_v30 = vrot.slane %v3409_v5, 1  ;;  %v757_v35 = vrot.slane %v3418_v7, 1  ;;  %vm1069_vm3 = vcmask 261120  }
  0x14   :  { %2836 = vmatprep.subr.bf16.mxu0 %v3326_v1  ;;  %2866 = vmatprep.subr.bf16.mxu1 %v3326_v1  ;;  %v60_v29 = vpack.c.bf16 %v2620_v28, %v2620_v28  ;;  %v2623_v33 = vld [vmem:[%s3898_s0 + $0x40] sm:$0x3]  ;;  %v3579_v40 = vld [vmem:[%s3903_s5 + $0x8] sm:$0xff]   ;;  %s3328_s25 = smov 64   ;;  %s3329_s28 = smov 32   ;;  %vm1205_vm4 = vcmask 254976  }
  0x15   :  { %v288_v25 = vrot.slane %v58_v23, 1  ;;  %v62_v34 = vpack.c.bf16 %v2623_v33, %v2623_v33  ;;  %v3568_v38 = vld [vmem:[%s3903_s5] sm:$0xff]   ;;  %v3166_v41 = vld [vmem:[%s3902_s4 + $0x8] sm:$0xff]   ;;  %vm1374_vm5 = vcmask 259076   ;;  %vm1289_vm6 = vcmask 257026  }
  0x16   :  { %v531_v31 = vrot.slane %v60_v29, 1  ;;  %v3164_v39 = vld [vmem:[%s3902_s4] sm:$0xff]   ;;  %vm1459_vm7 = vcmask 261126   ;;  %vm2602_vm8 = vcmask 74752  }
  0x17   :  { %v289_v26 = vsel %vm286_vm2, %v287_v24, %v288_v25  ;;  %v758_v36 = vrot.slane %v62_v34, 1  ;;  %v1114_v42 = vld [vmem:[%s3905_s7] sm:$0x3] }
  0x18   :  { %v532_v32 = vsel %vm286_vm2, %v530_v30, %v531_v31  ;;  %v1116_v43 = vpack.c.bf16 %v1114_v42, %v1114_v42  ;;  %v2645_v44 = vld [vmem:[%s3900_s2] ss:$0 sm:$0xff] }
  0x19   :  { %v759_v37 = vsel %vm286_vm2, %v757_v35, %v758_v36  ;;  %v2646_v45 = vld [vmem:[%s3901_s3] ss:$0 sm:$0xff] }
  0x1a   :  { %v2662_v34 = vld [vmem:[%s3904_s6] ss:$0 sm:$0xff] }
  0x1d   :  { %2833 = vmatmul.mubr.msk.bf16.vlgmr.msra.gmra.mrb[0].mxu0 %vm85_vm0, %v3418_v7  ;;  %2863 = vmatmul.mubr.msk.bf16.vlgmr.msra.gmra.mrb[0].mxu1 %vm85_vm0, %v3445_v11 }
  0x1e   :  { %2837 = vmatpush3.bf16.msra.mxu0 %v3162_v21  ;;  %2867 = vmatpush3.bf16.msra.mxu1 %v3162_v21 }
  0x1f   :  { %2838 = vmatprep.mubr.msk.bf16.mxu0 %vm3327_vm1, %v3326_v1  ;;  %2868 = vmatprep.mubr.msk.bf16.mxu1 %vm3327_vm1, %v3326_v1 }
  0x20   :  { %2842 = vmatprep.subr.bf16.mxu0 %v3326_v1  ;;  %2872 = vmatprep.subr.bf16.mxu1 %v3326_v1 }
  0x29   :  { %2839 = vmatmul.mubr.msk.bf16.vlgmr.msra.gmra.mrb[0].mxu0 %vm85_vm0, %v3445_v11  ;;  %2869 = vmatmul.mubr.msk.bf16.vlgmr.msra.gmra.mrb[0].mxu1 %vm85_vm0, %v289_v26 }
  0x2a   :  { %2843 = vmatpush3.bf16.msra.mxu0 %v3163_v27  ;;  %2873 = vmatpush3.bf16.msra.mxu1 %v3163_v27 }
  0x2b   :  { %2844 = vmatprep.mubr.msk.bf16.mxu0 %vm3327_vm1, %v3326_v1  ;;  %2874 = vmatprep.mubr.msk.bf16.mxu1 %vm3327_vm1, %v3326_v1 }
  0x2c   :  { %2878 = vmatprep.subr.bf16.mxu0 %v3326_v1  ;;  %2908 = vmatprep.subr.bf16.mxu1 %v3326_v1 }
  0x35   :  { %2845 = vmatmul.mubr.msk.bf16.vlgmr.msra.gmra.mrb[0].mxu0 %vm85_vm0, %v289_v26  ;;  %2875 = vmatmul.mubr.msk.bf16.vlgmr.msra.gmra.mrb[0].mxu1 %vm85_vm0, %v532_v32 }
  0x36   :  { %2879 = vmatpush3.bf16.msra.mxu0 %v3394_v0  ;;  %2909 = vmatpush3.bf16.msra.mxu1 %v3394_v0 }
  0x37   :  { %2880 = vmatprep.mubr.msk.bf16.mxu0 %vm3327_vm1, %v3326_v1  ;;  %2910 = vmatprep.mubr.msk.bf16.mxu1 %vm3327_vm1, %v3326_v1 }
  0x38   :  { %2884 = vmatprep.subr.bf16.mxu0 %v3326_v1  ;;  %2914 = vmatprep.subr.bf16.mxu1 %v3326_v1 }
  0x3d   :  { %2881 = vmatmul.mubr.msk.bf16.vlgmr.msra.gmra.mrb[4].mxu0 %vm85_vm0, %v3445_v11  ;;  %2911 = vmatmul.mubr.msk.bf16.vlgmr.msra.gmra.mrb[4].mxu1 %vm85_vm0, %v289_v26 }
  0x3e   :  { %2885 = vmatpush3.bf16.msra.mxu0 %v3423_v8  ;;  %2915 = vmatpush3.bf16.msra.mxu1 %v3423_v8 }
  0x3f   :  { %2886 = vmatprep.mubr.msk.bf16.mxu0 %vm3327_vm1, %v3326_v1  ;;  %2916 = vmatprep.mubr.msk.bf16.mxu1 %vm3327_vm1, %v3326_v1 }
  0x40   :  { %2890 = vmatprep.subr.bf16.mxu0 %v3326_v1  ;;  %2920 = vmatprep.subr.bf16.mxu1 %v3326_v1 }
  0x49   :  { %2887 = vmatmul.mubr.msk.bf16.vlgmr.msra.gmra.mrb[4].mxu0 %vm85_vm0, %v3418_v7  ;;  %2917 = vmatmul.mubr.msk.bf16.vlgmr.msra.gmra.mrb[4].mxu1 %vm85_vm0, %v3445_v11 }
  0x4a   :  { %2891 = vmatpush3.bf16.msra.mxu0 %v3161_v18  ;;  %2921 = vmatpush3.bf16.msra.mxu1 %v3161_v18 }
  0x4b   :  { %2892 = vmatprep.mubr.msk.bf16.mxu0 %vm3327_vm1, %v3326_v1  ;;  %2922 = vmatprep.mubr.msk.bf16.mxu1 %vm3327_vm1, %v3326_v1 }
  0x4c   :  { %2896 = vmatprep.subr.bf16.mxu0 %v3326_v1  ;;  %2926 = vmatprep.subr.bf16.mxu1 %v3326_v1 }
  0x55   :  { %2893 = vmatmul.mubr.msk.bf16.vlgmr.msra.gmra.mrb[4].mxu0 %vm85_vm0, %v289_v26  ;;  %2923 = vmatmul.mubr.msk.bf16.vlgmr.msra.gmra.mrb[4].mxu1 %vm85_vm0, %v532_v32 }
  0x56   :  { %2897 = vmatpush3.bf16.msra.mxu0 %v3162_v21  ;;  %2927 = vmatpush3.bf16.msra.mxu1 %v3162_v21 }
  0x57   :  { %2898 = vmatprep.mubr.msk.bf16.mxu0 %vm3327_vm1, %v3326_v1  ;;  %2928 = vmatprep.mubr.msk.bf16.mxu1 %vm3327_vm1, %v3326_v1 }
  0x58   :  { %2902 = vmatprep.subr.bf16.mxu0 %v3326_v1  ;;  %2932 = vmatprep.subr.bf16.mxu1 %v3326_v1 }
  0x61   :  { %2899 = vmatmul.mubr.msk.bf16.vlgmr.msra.gmra.mrb[4].mxu0 %vm85_vm0, %v532_v32  ;;  %2929 = vmatmul.mubr.msk.bf16.vlgmr.msra.gmra.mrb[4].mxu1 %vm85_vm0, %v759_v37 }
  0x62   :  { %2903 = vmatpush3.bf16.msra.mxu0 %v3163_v27  ;;  %2933 = vmatpush3.bf16.msra.mxu1 %v3163_v27 }
  0x63   :  { %2904 = vmatprep.mubr.msk.bf16.mxu0 %vm3327_vm1, %v3326_v1  ;;  %2934 = vmatprep.mubr.msk.bf16.mxu1 %vm3327_vm1, %v3326_v1 }
  0x64   :  { %2938 = vmatprep.subr.bf16.mxu0 %v3326_v1  ;;  %2946 = vmatprep.subr.bf16.mxu1 %v3326_v1 }
  0x6d   :  { %2905 = vmatmul.mubr.msk.bf16.vlgmr.msra.gmra.mrb[4].mxu0 %vm85_vm0, %v759_v37  ;;  %2935 = vmatmul.mubr.msk.bf16.vlgmr.msra.gmra.mrb[4].mxu1 %vm85_vm0, %v3461_v20 }
  0x6e   :  { %2942 = vmatprep.mubr.msk.bf16.mxu0 %vm3327_vm1, %v3326_v1  ;;  %2950 = vmatprep.mubr.msk.bf16.mxu1 %vm3327_vm1, %v3326_v1 }
  0x6f   :  { %2947 = vmatpush3.bf16.msra.mxu1 %v3568_v38  ;;  %2939 = vmatpush3.bf16.msra.mxu0 %v3164_v39 }
  0x70   :  { %2948 = vmatprep.subr.bf16.mxu1 %v3326_v1  ;;  %2940 = vmatprep.subr.bf16.mxu0 %v3326_v1 }
  0x73   :  { %2949 = vmatpush3.bf16.msra.mxu1 %v3579_v40  ;;  %2941 = vmatpush3.bf16.msra.mxu0 %v3166_v41 }
  0x74   :  { %2962 = vmatprep.subr.bf16.mxu1 %v3326_v1  ;;  %2954 = vmatprep.subr.bf16.mxu0 %v3326_v1 }
  0x76   :  { %2951 = vmatmul.mubr.msk.bf16.vlgmr.msra.gmra.mrb[8].mxu1 %vm1069_vm3, %v1116_v43 }
  0x77   :  { %2963 = vmatpush3.bf16.msra.mxu1 %v3568_v38  ;;  %2966 = vmatprep.mubr.msk.bf16.mxu1 %vm3327_vm1, %v3326_v1 }
  0x78   :  { %2964 = vmatprep.subr.bf16.mxu1 %v3326_v1 }
  0x7b   :  { %2965 = vmatpush3.bf16.msra.mxu1 %v3579_v40 }
  0x7c   :  { %2978 = vmatprep.subr.bf16.mxu1 %v3326_v1 }
 0x108   :  { %v333_v46 = vpop.f32.mrb[0].mxu0  ;;  %v570_v47 = vpop.f32.mrb[0].mxu1 }
 0x109   :  { %v348_v48 = vmul.f32 %v2645_v44, %v333_v46  ;;  %v579_v49 = vmul.f32 %v2645_v44, %v570_v47  ;;  %v2846_v50 = vpop.f32.mrb[1].mxu0  ;;  %v2876_v51 = vpop.f32.mrb[1].mxu1 }
 0x10a   :  { %v336_v52 = vpop.f32.mrb[2].mxu0  ;;  %v573_v53 = vpop.f32.mrb[2].mxu1 }
 0x10b   :  { %v356_v54 = vadd.f32 %v2646_v45, %v348_v48  ;;  %v581_v55 = vadd.f32 %v2646_v45, %v579_v49  ;;  %v349_v56 = vmul.f32 %v2645_v44, %v336_v52  ;;  %v580_v57 = vmul.f32 %v2645_v44, %v573_v53  ;;  %v2847_v58 = vpop.f32.mrb[3].mxu0  ;;  %v2877_v59 = vpop.f32.mrb[3].mxu1 }
 0x10d   :  { %v358_v60 = vmax.f32 %v356_v54, 0.0  ;;  %v583_v61 = vmax.f32 %v581_v55, 0.0  ;;  %v357_v62 = vadd.f32 %v2646_v45, %v349_v56  ;;  %v582_v63 = vadd.f32 %v2646_v45, %v580_v57 }
 0x10f   :  { %v585_v0 = vmax.f32 %v358_v60, %v583_v61  ;;  %v359_v2 = vmax.f32 %v357_v62, 0.0  ;;  %v584_v3 = vmax.f32 %v582_v63, 0.0 }
 0x111   :  { %v586_v4 = vmax.f32 %v359_v2, %v584_v3 }
 0x140   :  { %v797_v5 = vpop.f32.mrb[4].mxu0  ;;  %v1024_v6 = vpop.f32.mrb[4].mxu1 }
 0x141   :  { %v806_v7 = vmul.f32 %v2645_v44, %v797_v5  ;;  %v1033_v8 = vmul.f32 %v2645_v44, %v1024_v6  ;;  %v2906_v9 = vpop.f32.mrb[5].mxu0  ;;  %v2936_v10 = vpop.f32.mrb[5].mxu1 }
 0x142   :  { %v800_v11 = vpop.f32.mrb[6].mxu0  ;;  %v1027_v12 = vpop.f32.mrb[6].mxu1 }
 0x143   :  { %v808_v13 = vadd.f32 %v2646_v45, %v806_v7  ;;  %v1035_v14 = vadd.f32 %v2646_v45, %v1033_v8  ;;  %v807_v15 = vmul.f32 %v2645_v44, %v800_v11  ;;  %v1034_v16 = vmul.f32 %v2645_v44, %v1027_v12  ;;  %v2907_v17 = vpop.f32.mrb[7].mxu0  ;;  %v2937_v18 = vpop.f32.mrb[7].mxu1 }
 0x145   :  { %v810_v19 = vmax.f32 %v808_v13, 0.0  ;;  %v809_v20 = vadd.f32 %v2646_v45, %v807_v15  ;;  %v1036_v21 = vadd.f32 %v2646_v45, %v1034_v16  ;;  %v1037_v23 = vmax.f32 %v1035_v14, 0.0  ;;  %v1115_v45 = vld [vmem:[%s3906_s8] sm:$0x3] }
 0x147   :  { %v812_v22 = vmax.f32 %v585_v0, %v810_v19  ;;  %v811_v24 = vmax.f32 %v809_v20, 0.0  ;;  %v1038_v27 = vmax.f32 %v1036_v21, 0.0 }
 0x149   :  { %v1039_v25 = vmax.f32 %v812_v22, %v1037_v23  ;;  %v813_v26 = vmax.f32 %v586_v4, %v811_v24  ;;  %v1166_v30 = vpop.f32.mrb[8].mxu1 }
 0x14a   :  { %v2952_v31 = vpop.f32.mrb[9].mxu1 }
 0x14b   :  { %v1040_v28 = vmax.f32 %v813_v26, %v1038_v27  ;;  %v1169_v32 = vpop.f32.mrb[10].mxu1 }
 0x14c   :  { %v2953_v33 = vpop.f32.mrb[11].mxu1 }
 0x14d   :  { %v1050_v29 = vpack.c.bf16 %v1040_v28, %v1039_v25 }
 0x14f   :  { %2943 = vmatmul.mubr.msk.bf16.vlgmr.msra.gmra.mrb[8].mxu0 %vm1069_vm3, %v1050_v29 }
 0x150   :  { %2955 = vmatpush3.bf16.msra.mxu0 %v3568_v38  ;;  %2958 = vmatprep.mubr.msk.bf16.mxu0 %vm3327_vm1, %v3326_v1 }
 0x151   :  { %2956 = vmatprep.subr.bf16.mxu0 %v3326_v1 }
 0x154   :  { %2957 = vmatpush3.bf16.msra.mxu0 %v3579_v40 }
 0x155   :  { %2970 = vmatprep.subr.bf16.mxu0 %v3326_v1 }
 0x222   :  { %v1107_v35 = vpop.f32.mrb[8].mxu0 }
 0x223   :  { %v3613_v36 = vadd.f32 %v2662_v34, %v1107_v35  ;;  %v2944_v37 = vpop.f32.mrb[9].mxu0 }
 0x224   :  { %v1110_v39 = vpop.f32.mrb[10].mxu0 }
 0x225   :  { %v1172_v41 = vadd.f32 %v1166_v30, %v3613_v36  ;;  %v3616_v42 = vadd.f32 %v2662_v34, %v1110_v39  ;;  %v2945_v43 = vpop.f32.mrb[11].mxu0 }
 0x227   :  { %3174 = vtanh.f32 %v1172_v41  ;;  %v2669_v46 = vmul.f32 -1.442695, %v1172_v41 }
 0x229   :  { %3176 = vpow2.f32 %v2669_v46 }
 0x231   :  { %v3175_v44 = vpop.eup %3174 }
 0x232   :  { %1186 = vrot.lane.b32.xlu0 %v3175_v44, %s3328_s25 }
 0x233   :  { %v3177_v47 = vpop.eup %3176 }
 0x234   :  { %v1176_v48 = vadd.f32 1.0, %v3177_v47 }
 0x236   :  { %1181 = vrot.lane.b32.xlu0 %v1115_v45, %s3329_s28  ;;  %3178 = vrcp.f32 %v1176_v48 }
 0x240   :  { %v3179_v49 = vpop.eup %3178 }
 0x2a4   :  { %v1187_v50 = vpop.permute.xlu0 %1186 }
 0x2a5   :  { %v1189_v51 = vmul.f32 %v3179_v49, %v1187_v50 }
 0x2a7   :  { %1191 = vrot.lane.b32.xlu1 %v1189_v51, %s3329_s28 }
 0x2a8   :  { %v1182_v52 = vpop.permute.xlu0 %1181 }
 0x2a9   :  { %v1184_v53 = vmul.f32 %v3179_v49, %v1182_v52 }
 0x319   :  { %v1192_v54 = vpop.permute.xlu1 %1191 }
 0x31a   :  { %v1194_v55 = vadd.f32 %v1192_v54, %v1184_v53 }
 0x31c   :  { %3180 = vtanh.f32 %v1194_v55  ;;  %v1266_v11 = vrot.slane %v1194_v55, 6 }
 0x326   :  { %v3181_v56 = vpop.eup %3180 }
 0x327   :  { %1197 = vrot.lane.b32.xlu1 %v3181_v56, %s3328_s25 }
 0x399   :  { %v1198_v57 = vpop.permute.xlu1 %1197 }
 0x39a   :  { %v3625_v58 = vmul.f32 %v3179_v49, %v1198_v57 }
 0x39c   :  { %v1207_v59 = vpack.c.bf16 %v3625_v58, %v3625_v58 }
 0x39e   :  { %1209 = vrot.lane.b32.xlu0 %v1207_v59, %s3329_s28 }
 0x410   :  { %v1210_v60 = vpop.permute.xlu0 %1209 }
 0x411   :  { %2959 = vmatmul.mubr.msk.bf16.vlgmr.msra.gmra.mrb[12].mxu0 %vm1069_vm3, %v1210_v60 }
 0x412   :  { %2971 = vmatpush3.bf16.msra.mxu0 %v3568_v38  ;;  %2974 = vmatprep.mubr.msk.bf16.mxu0 %vm3327_vm1, %v3326_v1 }
 0x413   :  { %2972 = vmatprep.subr.bf16.mxu0 %v3326_v1 }
 0x416   :  { %2973 = vmatpush3.bf16.msra.mxu0 %v3579_v40 }
 0x417   :  { %2986 = vmatprep.subr.bf16.mxu0 %v3326_v1 }
 0x4e4   :  { %v1248_v61 = vpop.f32.mrb[12].mxu0 }
 0x4e5   :  { %v1255_v62 = vrot.slane %v1248_v61, 6  ;;  %v2960_v63 = vpop.f32.mrb[13].mxu0 }
 0x4e6   :  { %v1251_v0 = vpop.f32.mrb[14].mxu0 }
 0x4e7   :  { %v1257_v2 = vadd.f32 %v1255_v62, %v3613_v36  ;;  %v2961_v3 = vpop.f32.mrb[15].mxu0 }
 0x4e9   :  { %3182 = vtanh.f32 %v1257_v2  ;;  %v2671_v5 = vmul.f32 -1.442695, %v1257_v2 }
 0x4eb   :  { %3184 = vpow2.f32 %v2671_v5 }
 0x4f3   :  { %v3183_v4 = vpop.eup %3182 }
 0x4f4   :  { %1270 = vrot.lane.b32.xlu1 %v3183_v4, %s3328_s25 }
 0x4f5   :  { %v3185_v6 = vpop.eup %3184 }
 0x4f6   :  { %v1261_v7 = vadd.f32 1.0, %v3185_v6 }
 0x4f8   :  { %3186 = vrcp.f32 %v1261_v7 }
 0x502   :  { %v3187_v8 = vpop.eup %3186 }
 0x503   :  { %v1268_v12 = vmul.f32 %v3187_v8, %v1266_v11 }
 0x566   :  { %v1271_v9 = vpop.permute.xlu1 %1270 }
 0x567   :  { %v1273_v10 = vmul.f32 %v3187_v8, %v1271_v9 }
 0x569   :  { %1275 = vrot.lane.b32.xlu0 %v1273_v10, %s3329_s28 }
 0x5db   :  { %v1276_v13 = vpop.permute.xlu0 %1275 }
 0x5dc   :  { %v1278_v14 = vadd.f32 %v1276_v13, %v1268_v12 }
 0x5de   :  { %3188 = vtanh.f32 %v1278_v14  ;;  %v1351_v34 = vrot.slane %v1278_v14, 6 }
 0x5e8   :  { %v3189_v15 = vpop.eup %3188 }
 0x5e9   :  { %1281 = vrot.lane.b32.xlu1 %v3189_v15, %s3328_s25 }
 0x65b   :  { %v1282_v16 = vpop.permute.xlu1 %1281 }
 0x65c   :  { %v3641_v17 = vmul.f32 %v3187_v8, %v1282_v16 }
 0x65e   :  { %v1291_v18 = vpack.c.bf16 %v3641_v17, %v3641_v17 }
 0x660   :  { %v1293_v19 = vrot.slane %v1291_v18, 1 }
 0x662   :  { %1294 = vrot.lane.b32.xlu0 %v1293_v19, %s3329_s28 }
 0x6d4   :  { %v1295_v20 = vpop.permute.xlu0 %1294 }
 0x6d5   :  { %2967 = vmatmul.mubr.msk.bf16.vlgmr.msra.gmra.mrb[12].mxu1 %vm1069_vm3, %v1295_v20 }
 0x6d6   :  { %2979 = vmatpush3.bf16.msra.mxu1 %v3568_v38  ;;  %2982 = vmatprep.mubr.msk.bf16.mxu1 %vm3327_vm1, %v3326_v1 }
 0x6d7   :  { %2980 = vmatprep.subr.bf16.mxu1 %v3326_v1 }
 0x6da   :  { %2981 = vmatpush3.bf16.msra.mxu1 %v3579_v40 }
 0x6db   :  { %2994 = vmatprep.subr.bf16.mxu1 %v3326_v1 }
 0x7a8   :  { %v1333_v21 = vpop.f32.mrb[12].mxu1 }
 0x7a9   :  { %v1340_v22 = vrot.slane %v1333_v21, 4  ;;  %v2968_v23 = vpop.f32.mrb[13].mxu1 }
 0x7aa   :  { %v1336_v24 = vpop.f32.mrb[14].mxu1 }
 0x7ab   :  { %v1342_v25 = vadd.f32 %v1340_v22, %v3613_v36  ;;  %v2969_v26 = vpop.f32.mrb[15].mxu1 }
 0x7ad   :  { %3190 = vtanh.f32 %v1342_v25  ;;  %v2673_v28 = vmul.f32 -1.442695, %v1342_v25 }
 0x7af   :  { %3192 = vpow2.f32 %v2673_v28 }
 0x7b7   :  { %v3191_v27 = vpop.eup %3190 }
 0x7b8   :  { %1355 = vrot.lane.b32.xlu1 %v3191_v27, %s3328_s25 }
 0x7b9   :  { %v3193_v29 = vpop.eup %3192 }
 0x7ba   :  { %v1346_v30 = vadd.f32 1.0, %v3193_v29 }
 0x7bc   :  { %3194 = vrcp.f32 %v1346_v30 }
 0x7c6   :  { %v3195_v31 = vpop.eup %3194 }
 0x7c7   :  { %v1353_v35 = vmul.f32 %v3195_v31, %v1351_v34 }
 0x82a   :  { %v1356_v32 = vpop.permute.xlu1 %1355 }
 0x82b   :  { %v1358_v33 = vmul.f32 %v3195_v31, %v1356_v32 }
 0x82d   :  { %1360 = vrot.lane.b32.xlu0 %v1358_v33, %s3329_s28 }
 0x89f   :  { %v1361_v37 = vpop.permute.xlu0 %1360 }
 0x8a0   :  { %v1363_v39 = vadd.f32 %v1361_v37, %v1353_v35 }
 0x8a2   :  { %3196 = vtanh.f32 %v1363_v39  ;;  %v1436_v62 = vrot.slane %v1363_v39, 6 }
 0x8ac   :  { %v3197_v41 = vpop.eup %3196 }
 0x8ad   :  { %1366 = vrot.lane.b32.xlu1 %v3197_v41, %s3328_s25 }
 0x91f   :  { %v1367_v43 = vpop.permute.xlu1 %1366 }
 0x920   :  { %v3657_v44 = vmul.f32 %v3195_v31, %v1367_v43 }
 0x922   :  { %v1376_v45 = vpack.c.bf16 %v3657_v44, %v3657_v44 }
 0x924   :  { %v1378_v46 = vrot.slane %v1376_v45, 2 }
 0x926   :  { %1379 = vrot.lane.b32.xlu0 %v1378_v46, %s3329_s28 }
 0x998   :  { %v1380_v47 = vpop.permute.xlu0 %1379 }
 0x999   :  { %2975 = vmatmul.mubr.msk.bf16.vlgmr.msra.gmra.mrb[16].mxu0 %vm1069_vm3, %v1380_v47 }
 0x99a   :  { %2987 = vmatpush3.bf16.msra.mxu0 %v3568_v38  ;;  %2990 = vmatprep.mubr.msk.bf16.mxu0 %vm3327_vm1, %v3326_v1 }
 0x99b   :  { %2988 = vmatprep.subr.bf16.mxu0 %v3326_v1 }
 0x99e   :  { %2989 = vmatpush3.bf16.msra.mxu0 %v3579_v40 }
 0x99f   :  { %3002 = vmatprep.subr.bf16.mxu0 %v3326_v1 }
 0xa6c   :  { %v1418_v48 = vpop.f32.mrb[16].mxu0 }
 0xa6d   :  { %v1425_v49 = vrot.slane %v1418_v48, 2  ;;  %v2976_v50 = vpop.f32.mrb[17].mxu0 }
 0xa6e   :  { %v1421_v51 = vpop.f32.mrb[18].mxu0 }
 0xa6f   :  { %v1427_v52 = vadd.f32 %v1425_v49, %v3613_v36  ;;  %v2977_v53 = vpop.f32.mrb[19].mxu0 }
 0xa71   :  { %3198 = vtanh.f32 %v1427_v52  ;;  %v2675_v55 = vmul.f32 -1.442695, %v1427_v52 }
 0xa73   :  { %3200 = vpow2.f32 %v2675_v55 }
 0xa7b   :  { %v3199_v54 = vpop.eup %3198 }
 0xa7c   :  { %1440 = vrot.lane.b32.xlu1 %v3199_v54, %s3328_s25 }
 0xa7d   :  { %v3201_v56 = vpop.eup %3200 }
 0xa7e   :  { %v1431_v57 = vadd.f32 1.0, %v3201_v56 }
 0xa80   :  { %3202 = vrcp.f32 %v1431_v57 }
 0xa8a   :  { %v3203_v59 = vpop.eup %3202 }
 0xa8b   :  { %v1438_v63 = vmul.f32 %v3203_v59, %v1436_v62 }
 0xaee   :  { %v1441_v60 = vpop.permute.xlu1 %1440 }
 0xaef   :  { %v1443_v61 = vmul.f32 %v3203_v59, %v1441_v60 }
 0xaf1   :  { %1445 = vrot.lane.b32.xlu0 %v1443_v61, %s3329_s28 }
 0xb63   :  { %v1446_v0 = vpop.permute.xlu0 %1445 }
 0xb64   :  { %v1448_v2 = vadd.f32 %v1446_v0, %v1438_v63 }
 0xb66   :  { %3204 = vtanh.f32 %v1448_v2  ;;  %v1518_v21 = vrot.slane %v1448_v2, 6 }
 0xb70   :  { %v3205_v36 = vpop.eup %3204 }
 0xb71   :  { %1451 = vrot.lane.b32.xlu1 %v3205_v36, %s3328_s25 }
 0xbe3   :  { %v1452_v3 = vpop.permute.xlu1 %1451 }
 0xbe4   :  { %v3673_v4 = vmul.f32 %v3203_v59, %v1452_v3 }
 0xbe6   :  { %v1461_v5 = vpack.c.bf16 %v3673_v4, %v3673_v4 }
 0xbe8   :  { %v1463_v6 = vrot.slane %v1461_v5, 3 }
 0xbea   :  { %1464 = vrot.lane.b32.xlu0 %v1463_v6, %s3329_s28 }
 0xc5c   :  { %v1465_v7 = vpop.permute.xlu0 %1464 }
 0xc5d   :  { %2983 = vmatmul.mubr.msk.bf16.vlgmr.msra.gmra.mrb[16].mxu1 %vm1069_vm3, %v1465_v7 }
 0xc5e   :  { %2995 = vmatpush3.bf16.msra.mxu1 %v3568_v38  ;;  %2998 = vmatprep.mubr.msk.bf16.mxu1 %vm3327_vm1, %v3326_v1 }
 0xc5f   :  { %2996 = vmatprep.subr.bf16.mxu1 %v3326_v1 }
 0xc62   :  { %2997 = vmatpush3.bf16.msra.mxu1 %v3579_v40 }
 0xc63   :  { %3010 = vmatprep.subr.bf16.mxu1 %v3326_v1 }
 0xd30   :  { %v1503_v8 = vpop.f32.mrb[16].mxu1 }
 0xd31   :  { %v1509_v9 = vadd.f32 %v1503_v8, %v3616_v42  ;;  %v2984_v10 = vpop.f32.mrb[17].mxu1 }
 0xd32   :  { %v1506_v11 = vpop.f32.mrb[18].mxu1 }
 0xd33   :  { %3206 = vtanh.f32 %v1509_v9  ;;  %v2985_v12 = vpop.f32.mrb[19].mxu1  ;;  %v2677_v14 = vmul.f32 -1.442695, %v1509_v9 }
 0xd35   :  { %3208 = vpow2.f32 %v2677_v14 }
 0xd3d   :  { %v3207_v13 = vpop.eup %3206 }
 0xd3e   :  { %1522 = vrot.lane.b32.xlu1 %v3207_v13, %s3328_s25 }
 0xd3f   :  { %v3209_v15 = vpop.eup %3208 }
 0xd40   :  { %v1513_v16 = vadd.f32 1.0, %v3209_v15 }
 0xd42   :  { %3210 = vrcp.f32 %v1513_v16 }
 0xd4c   :  { %v3211_v18 = vpop.eup %3210 }
 0xd4d   :  { %v1520_v22 = vmul.f32 %v3211_v18, %v1518_v21 }
 0xdb0   :  { %v1523_v19 = vpop.permute.xlu1 %1522 }
 0xdb1   :  { %v1525_v20 = vmul.f32 %v3211_v18, %v1523_v19 }
 0xdb3   :  { %1527 = vrot.lane.b32.xlu0 %v1525_v20, %s3329_s28 }
 0xe25   :  { %v1528_v23 = vpop.permute.xlu0 %1527 }
 0xe26   :  { %v1530_v24 = vadd.f32 %v1528_v23, %v1520_v22 }
 0xe28   :  { %3212 = vtanh.f32 %v1530_v24  ;;  %v1601_v46 = vrot.slane %v1530_v24, 6 }
 0xe32   :  { %v3213_v25 = vpop.eup %3212 }
 0xe33   :  { %1533 = vrot.lane.b32.xlu1 %v3213_v25, %s3328_s25 }
 0xea5   :  { %v1534_v26 = vpop.permute.xlu1 %1533 }
 0xea6   :  { %v3689_v27 = vmul.f32 %v3211_v18, %v1534_v26 }
 0xea8   :  { %v1542_v28 = vpack.c.bf16 %v3689_v27, %v3689_v27 }
 0xeaa   :  { %1544 = vrot.lane.b32.xlu0 %v1542_v28, %s3329_s28 }
 0xf1c   :  { %v1545_v29 = vpop.permute.xlu0 %1544 }
 0xf1d   :  { %2991 = vmatmul.mubr.msk.bf16.vlgmr.msra.gmra.mrb[20].mxu0 %vm1069_vm3, %v1545_v29 }
 0xf1e   :  { %3003 = vmatpush3.bf16.msra.mxu0 %v3568_v38  ;;  %3006 = vmatprep.mubr.msk.bf16.mxu0 %vm3327_vm1, %v3326_v1 }
 0xf1f   :  { %3004 = vmatprep.subr.bf16.mxu0 %v3326_v1 }
 0xf22   :  { %3005 = vmatpush3.bf16.msra.mxu0 %v3579_v40 }
 0xf23   :  { %3018 = vmatprep.subr.bf16.mxu0 %v3326_v1 }
 0xff0   :  { %v1583_v30 = vpop.f32.mrb[20].mxu0 }
 0xff1   :  { %v1590_v31 = vrot.slane %v1583_v30, 6  ;;  %v2992_v32 = vpop.f32.mrb[21].mxu0 }
 0xff2   :  { %v1586_v33 = vpop.f32.mrb[22].mxu0 }
 0xff3   :  { %v1592_v34 = vadd.f32 %v1590_v31, %v3616_v42  ;;  %v2993_v35 = vpop.f32.mrb[23].mxu0 }
 0xff5   :  { %3214 = vtanh.f32 %v1592_v34  ;;  %v2679_v38 = vmul.f32 -1.442695, %v1592_v34 }
 0xff7   :  { %3216 = vpow2.f32 %v2679_v38 }
 0xfff   :  { %v3215_v37 = vpop.eup %3214 }
0x1000   :  { %1605 = vrot.lane.b32.xlu1 %v3215_v37, %s3328_s25 }
0x1001   :  { %v3217_v39 = vpop.eup %3216 }
0x1002   :  { %v1596_v41 = vadd.f32 1.0, %v3217_v39  ;;  %v3744_v39 = vld [vmem:[%s3903_s5 + $0x10] sm:$0xff]  }
0x1004   :  { %3218 = vrcp.f32 %v1596_v41  ;;  %v2697_v41 = vld [vmem:[%s3905_s7 + $0x2] sm:$0x3] }
0x100e   :  { %v3219_v43 = vpop.eup %3218 }
0x100f   :  { %v1603_v47 = vmul.f32 %v3219_v43, %v1601_v46 }
0x1072   :  { %v1606_v40 = vpop.permute.xlu1 %1605 }
0x1073   :  { %v1608_v45 = vmul.f32 %v3219_v43, %v1606_v40 }
0x1075   :  { %1610 = vrot.lane.b32.xlu0 %v1608_v45, %s3329_s28 }
0x10e7   :  { %v1611_v48 = vpop.permute.xlu0 %1610 }
0x10e8   :  { %v1613_v49 = vadd.f32 %v1611_v48, %v1603_v47  ;;  %v2698_v47 = vld [vmem:[%s3906_s8 + $0x2] sm:$0x3] }
0x10ea   :  { %3220 = vtanh.f32 %v1613_v49  ;;  %v1685_v7 = vrot.slane %v1613_v49, 6 }
0x10f4   :  { %v3221_v50 = vpop.eup %3220 }
0x10f5   :  { %1616 = vrot.lane.b32.xlu1 %v3221_v50, %s3328_s25 }
0x1167   :  { %v1617_v51 = vpop.permute.xlu1 %1616 }
0x1168   :  { %v3705_v52 = vmul.f32 %v3219_v43, %v1617_v51  ;;  %v1874_v43 = vpack.c.bf16 %v2697_v41, %v2697_v41 }
0x116a   :  { %v1625_v53 = vpack.c.bf16 %v3705_v52, %v3705_v52 }
0x116c   :  { %v1627_v54 = vrot.slane %v1625_v53, 1 }
0x116e   :  { %1628 = vrot.lane.b32.xlu0 %v1627_v54, %s3329_s28 }
0x11e0   :  { %v1629_v55 = vpop.permute.xlu0 %1628 }
0x11e1   :  { %2999 = vmatmul.mubr.msk.bf16.vlgmr.msra.gmra.mrb[20].mxu1 %vm1069_vm3, %v1629_v55 }
0x11e2   :  { %3014 = vmatprep.mubr.msk.bf16.mxu1 %vm3327_vm1, %v3326_v1 }
0x12b4   :  { %v1667_v56 = vpop.f32.mrb[20].mxu1 }
0x12b5   :  { %v1674_v57 = vrot.slane %v1667_v56, 4  ;;  %v3000_v59 = vpop.f32.mrb[21].mxu1 }
0x12b6   :  { %v1670_v60 = vpop.f32.mrb[22].mxu1  ;;  %v2693_v59 = vld [vmem:[%s3904_s6 + $0x1] ss:$0 sm:$0xff] }
0x12b7   :  { %v1676_v61 = vadd.f32 %v1674_v57, %v3616_v42  ;;  %v3001_v62 = vpop.f32.mrb[23].mxu1 }
0x12b9   :  { %3222 = vtanh.f32 %v1676_v61  ;;  %v2681_v0 = vmul.f32 -1.442695, %v1676_v61 }
0x12bb   :  { %3224 = vpow2.f32 %v2681_v0 }
0x12c3   :  { %v3223_v63 = vpop.eup %3222 }
0x12c4   :  { %1689 = vrot.lane.b32.xlu1 %v3223_v63, %s3328_s25 }
0x12c5   :  { %v3225_v2 = vpop.eup %3224 }
0x12c6   :  { %v1680_v36 = vadd.f32 1.0, %v3225_v2 }
0x12c8   :  { %3226 = vrcp.f32 %v1680_v36 }
0x12d2   :  { %v3227_v3 = vpop.eup %3226 }
0x12d3   :  { %v1687_v8 = vmul.f32 %v3227_v3, %v1685_v7 }
0x1336   :  { %v1690_v5 = vpop.permute.xlu1 %1689 }
0x1337   :  { %v1692_v6 = vmul.f32 %v3227_v3, %v1690_v5 }
0x1339   :  { %1694 = vrot.lane.b32.xlu0 %v1692_v6, %s3329_s28 }
0x13ab   :  { %v1695_v9 = vpop.permute.xlu0 %1694 }
0x13ac   :  { %v1697_v10 = vadd.f32 %v1695_v9, %v1687_v8 }
0x13ae   :  { %3228 = vtanh.f32 %v1697_v10 }
0x13b8   :  { %v3229_v11 = vpop.eup %3228 }
0x13b9   :  { %1700 = vrot.lane.b32.xlu1 %v3229_v11, %s3328_s25 }
0x142b   :  { %v1701_v12 = vpop.permute.xlu1 %1700 }
0x142c   :  { %v1703_v13 = vmul.f32 %v3227_v3, %v1701_v12 }
0x142e   :  { %v1709_v14 = vpack.c.bf16 %v1703_v13, %v1703_v13 }
0x1430   :  { %v1711_v15 = vrot.slane %v1709_v14, 2 }
0x1432   :  { %1712 = vrot.lane.b32.xlu0 %v1711_v15, %s3329_s28 }
0x14a4   :  { %v1713_v16 = vpop.permute.xlu0 %1712 }
0x14a5   :  { %3007 = vmatmul.mubr.msk.bf16.vlgmr.msra.gmra.mrb[24].mxu0 %vm1069_vm3, %v1713_v16 }
0x14a6   :  { %3022 = vmatprep.mubr.msk.bf16.mxu0 %vm3327_vm1, %v3326_v1  ;;  %3019 = vmatpush3.bf16.msra.mxu0 %v3744_v39 }
0x14a7   :  { %3020 = vmatprep.subr.bf16.mxu0 %v3326_v1 }
0x1578   :  { %v1751_v18 = vpop.f32.mrb[24].mxu0 }
0x1579   :  { %v1758_v19 = vrot.slane %v1751_v18, 2  ;;  %v3008_v20 = vpop.f32.mrb[25].mxu0 }
0x157a   :  { %v1754_v21 = vpop.f32.mrb[26].mxu0 }
0x157b   :  { %v1760_v22 = vadd.f32 %v1758_v19, %v3616_v42  ;;  %v3009_v23 = vpop.f32.mrb[27].mxu0  ;;  %v1769_v42 = vrot.slane %v1697_v10, 6 }
0x157d   :  { %3230 = vtanh.f32 %v1760_v22  ;;  %v2683_v25 = vmul.f32 -1.442695, %v1760_v22 }
0x157f   :  { %3232 = vpow2.f32 %v2683_v25 }
0x1587   :  { %v3231_v24 = vpop.eup %3230 }
0x1588   :  { %1773 = vrot.lane.b32.xlu1 %v3231_v24, %s3328_s25 }
0x1589   :  { %v3233_v26 = vpop.eup %3232 }
0x158a   :  { %v1764_v28 = vadd.f32 1.0, %v3233_v26 }
0x158c   :  { %3234 = vrcp.f32 %v1764_v28 }
0x1596   :  { %v3235_v29 = vpop.eup %3234 }
0x1597   :  { %v1771_v32 = vmul.f32 %v3235_v29, %v1769_v42 }
0x15fa   :  { %v1774_v30 = vpop.permute.xlu1 %1773 }
0x15fb   :  { %v1776_v31 = vmul.f32 %v3235_v29, %v1774_v30 }
0x15fd   :  { %1778 = vrot.lane.b32.xlu0 %v1776_v31, %s3329_s28 }
0x1601   :  { %1202 = vrot.lane.b32.xlu0 %v3625_v58, %s3329_s28 }
0x1605   :  { %1371 = vrot.lane.b32.xlu0 %v3657_v44, %s3329_s28 }
0x1609   :  { %1538 = vrot.lane.b32.xlu0 %v3689_v27, %s3329_s28  ;;  %v3168_v27 = vld [vmem:[%s3902_s4 + $0x10] sm:$0xff]  }
0x160a   :  { %3011 = vmatpush3.bf16.msra.mxu1 %v3168_v27 }
0x160b   :  { %3012 = vmatprep.subr.bf16.mxu1 %v3326_v1 }
0x160d   :  { %1705 = vrot.lane.b32.xlu0 %v1703_v13, %s3329_s28 }
0x166f   :  { %v1779_v33 = vpop.permute.xlu0 %1778 }
0x1670   :  { %v1781_v34 = vadd.f32 %v1779_v33, %v1771_v32 }
0x1672   :  { %3236 = vtanh.f32 %v1781_v34 }
0x1673   :  { %v1203_v35 = vpop.permute.xlu0 %1202 }
0x1674   :  { %1206 = vst.msk [vmem:[#allocation2] sm:$0x3] %vm1205_vm4, %v1203_v35 }
0x1677   :  { %v1372_v37 = vpop.permute.xlu0 %1371 }
0x1678   :  { %1375 = vst.msk [vmem:[#allocation2] sm:$0x30] %vm1374_vm5, %v1372_v37 }
0x167b   :  { %v1539_v58 = vpop.permute.xlu0 %1538 }
0x167c   :  { %v3237_v38 = vpop.eup %3236  ;;  %1541 = vst.msk [vmem:[#allocation2 + $0x8] sm:$0x3] %vm1205_vm4, %v1539_v58 }
0x167d   :  { %1784 = vrot.lane.b32.xlu1 %v3237_v38, %s3328_s25 }
0x167f   :  { %v1706_v44 = vpop.permute.xlu0 %1705 }
0x1680   :  { %1708 = vst.msk [vmem:[#allocation2 + $0x8] sm:$0x30] %vm1374_vm5, %v1706_v44 }
0x1681   :  { %1286 = vrot.lane.b32.xlu1 %v3641_v17, %s3329_s28  ;;  %v3170_v17 = vld [vmem:[%s3902_s4 + $0x18] sm:$0xff]  }
0x1682   :  { %3013 = vmatpush3.bf16.msra.mxu1 %v3170_v17 }
0x1683   :  { %3026 = vmatprep.subr.bf16.mxu1 %v3326_v1 }
0x1685   :  { %1456 = vrot.lane.b32.xlu1 %v3673_v4, %s3329_s28  ;;  %v3753_v4 = vld [vmem:[%s3903_s5 + $0x18] sm:$0xff]  }
0x1686   :  { %3021 = vmatpush3.bf16.msra.mxu0 %v3753_v4 }
0x1687   :  { %3034 = vmatprep.subr.bf16.mxu0 %v3326_v1 }
0x1689   :  { %1621 = vrot.lane.b32.xlu1 %v3705_v52, %s3329_s28  ;;  %3023 = vmatmul.mubr.msk.bf16.vlgmr.msra.gmra.mrb[28].mxu0 %vm1069_vm3, %v1874_v43 }
0x168a   :  { %3035 = vmatpush3.bf16.msra.mxu0 %v3744_v39  ;;  %3038 = vmatprep.mubr.msk.bf16.mxu0 %vm3327_vm1, %v3326_v1 }
0x168b   :  { %3036 = vmatprep.subr.bf16.mxu0 %v3326_v1 }
0x168e   :  { %3037 = vmatpush3.bf16.msra.mxu0 %v3753_v4 }
0x168f   :  { %3050 = vmatprep.subr.bf16.mxu0 %v3326_v1 }
0x16ef   :  { %v1785_v40 = vpop.permute.xlu1 %1784 }
0x16f0   :  { %v1787_v45 = vmul.f32 %v3235_v29, %v1785_v40 }
0x16f2   :  { %1789 = vrot.lane.b32.xlu1 %v1787_v45, %s3329_s28 }
0x16f3   :  { %v1287_v46 = vpop.permute.xlu1 %1286 }
0x16f4   :  { %1290 = vst.msk [vmem:[#allocation2] sm:$0xc] %vm1289_vm6, %v1287_v46 }
0x16f6   :  { %1939 = vrot.lane.b32.xlu1 %v2698_v47, %s3329_s28 }
0x16f7   :  { %v1457_v48 = vpop.permute.xlu1 %1456 }
0x16f8   :  { %1460 = vst.msk [vmem:[#allocation2] sm:$0xc0] %vm1459_vm7, %v1457_v48 }
0x16fb   :  { %v1622_v49 = vpop.permute.xlu1 %1621 }
0x16fc   :  { %1624 = vst.msk [vmem:[#allocation2 + $0x8] sm:$0xc] %vm1289_vm6, %v1622_v49 }
0x16ff   :  { %v1793_v51 = vld [vmem:[#allocation2] sm:$0xff] }
0x175c   :  { %v1924_v54 = vpop.f32.mrb[28].mxu0 }
0x175d   :  { %v3024_v55 = vpop.f32.mrb[29].mxu0 }
0x175e   :  { %v1927_v56 = vpop.f32.mrb[30].mxu0 }
0x175f   :  { %v3025_v57 = vpop.f32.mrb[31].mxu0 }
0x1764   :  { %v1790_v50 = vpop.permute.xlu1 %1789 }
0x1765   :  { %1792 = vst.msk [vmem:[#allocation2 + $0x8] sm:$0xc0] %vm1459_vm7, %v1790_v50 }
0x1768   :  { %v1940_v11 = vpop.permute.xlu1 %1939 }
0x176c   :  { %v1794_v52 = vld [vmem:[#allocation2 + $0x8] sm:$0xff] }
0x176d   :  { %v1807_v53 = vpack.c.bf16 %v1794_v52, %v1793_v51 }
0x176f   :  { %3015 = vmatmul.mubr.msk.bf16.vlgmr.msra.gmra.mrb[24].mxu1 %vm1069_vm3, %v1807_v53 }
0x1770   :  { %3027 = vmatpush3.bf16.msra.mxu1 %v3744_v39  ;;  %3030 = vmatprep.mubr.msk.bf16.mxu1 %vm3327_vm1, %v3326_v1 }
0x1771   :  { %3028 = vmatprep.subr.bf16.mxu1 %v3326_v1 }
0x1774   :  { %3029 = vmatpush3.bf16.msra.mxu1 %v3753_v4 }
0x1775   :  { %3042 = vmatprep.subr.bf16.mxu1 %v3326_v1 }
0x1842   :  { %v1863_v60 = vpop.f32.mrb[24].mxu1 }
0x1843   :  { %v3785_v61 = vadd.f32 %v2693_v59, %v1863_v60  ;;  %v3016_v62 = vpop.f32.mrb[25].mxu1 }
0x1844   :  { %v1866_v63 = vpop.f32.mrb[26].mxu1 }
0x1845   :  { %v1930_v0 = vadd.f32 %v1924_v54, %v3785_v61  ;;  %v3788_v2 = vadd.f32 %v2693_v59, %v1866_v63  ;;  %v3017_v36 = vpop.f32.mrb[27].mxu1 }
0x1847   :  { %3238 = vtanh.f32 %v1930_v0  ;;  %v2702_v5 = vmul.f32 -1.442695, %v1930_v0 }
0x1849   :  { %3240 = vpow2.f32 %v2702_v5 }
0x1851   :  { %v3239_v3 = vpop.eup %3238 }
0x1852   :  { %1944 = vrot.lane.b32.xlu0 %v3239_v3, %s3328_s25 }
0x1853   :  { %v3241_v6 = vpop.eup %3240 }
0x1854   :  { %v1934_v7 = vadd.f32 1.0, %v3241_v6 }
0x1856   :  { %3242 = vrcp.f32 %v1934_v7 }
0x1860   :  { %v3243_v8 = vpop.eup %3242 }
0x1861   :  { %v1942_v12 = vmul.f32 %v3243_v8, %v1940_v11 }
0x18c4   :  { %v1945_v9 = vpop.permute.xlu0 %1944 }
0x18c5   :  { %v1947_v10 = vmul.f32 %v3243_v8, %v1945_v9 }
0x18c7   :  { %1949 = vrot.lane.b32.xlu0 %v1947_v10, %s3329_s28 }
0x1939   :  { %v1950_v13 = vpop.permute.xlu0 %1949 }
0x193a   :  { %v1952_v14 = vadd.f32 %v1950_v13, %v1942_v12 }
0x193c   :  { %3244 = vtanh.f32 %v1952_v14  ;;  %v2018_v34 = vrot.slane %v1952_v14, 6 }
0x1946   :  { %v3245_v15 = vpop.eup %3244 }
0x1947   :  { %1955 = vrot.lane.b32.xlu1 %v3245_v15, %s3328_s25 }
0x19b9   :  { %v1956_v16 = vpop.permute.xlu1 %1955 }
0x19ba   :  { %v3793_v18 = vmul.f32 %v3243_v8, %v1956_v16 }
0x19bc   :  { %v1959_v19 = vpack.c.bf16 %v3793_v18, %v3793_v18 }
0x19be   :  { %1961 = vrot.lane.b32.xlu0 %v1959_v19, %s3329_s28 }
0x1a30   :  { %v1962_v20 = vpop.permute.xlu0 %1961 }
0x1a31   :  { %3031 = vmatmul.mubr.msk.bf16.vlgmr.msra.gmra.mrb[28].mxu1 %vm1069_vm3, %v1962_v20 }
0x1a32   :  { %3043 = vmatpush3.bf16.msra.mxu1 %v3744_v39  ;;  %3046 = vmatprep.mubr.msk.bf16.mxu1 %vm3327_vm1, %v3326_v1 }
0x1a33   :  { %3044 = vmatprep.subr.bf16.mxu1 %v3326_v1 }
0x1a36   :  { %3045 = vmatpush3.bf16.msra.mxu1 %v3753_v4 }
0x1a37   :  { %3058 = vmatprep.subr.bf16.mxu1 %v3326_v1 }
0x1b04   :  { %v2000_v21 = vpop.f32.mrb[28].mxu1 }
0x1b05   :  { %v2007_v22 = vrot.slane %v2000_v21, 6  ;;  %v3032_v23 = vpop.f32.mrb[29].mxu1 }
0x1b06   :  { %v2003_v24 = vpop.f32.mrb[30].mxu1 }
0x1b07   :  { %v2009_v25 = vadd.f32 %v2007_v22, %v3785_v61  ;;  %v3033_v26 = vpop.f32.mrb[31].mxu1 }
0x1b09   :  { %3246 = vtanh.f32 %v2009_v25  ;;  %v2704_v29 = vmul.f32 -1.442695, %v2009_v25 }
0x1b0b   :  { %3248 = vpow2.f32 %v2704_v29 }
0x1b13   :  { %v3247_v28 = vpop.eup %3246 }
0x1b14   :  { %2022 = vrot.lane.b32.xlu1 %v3247_v28, %s3328_s25 }
0x1b15   :  { %v3249_v30 = vpop.eup %3248 }
0x1b16   :  { %v2013_v31 = vadd.f32 1.0, %v3249_v30 }
0x1b18   :  { %3250 = vrcp.f32 %v2013_v31 }
0x1b22   :  { %v3251_v42 = vpop.eup %3250 }
0x1b23   :  { %v2020_v35 = vmul.f32 %v3251_v42, %v2018_v34 }
0x1b86   :  { %v2023_v32 = vpop.permute.xlu1 %2022 }
0x1b87   :  { %v2025_v33 = vmul.f32 %v3251_v42, %v2023_v32 }
0x1b89   :  { %2027 = vrot.lane.b32.xlu0 %v2025_v33, %s3329_s28 }
0x1bfb   :  { %v2028_v37 = vpop.permute.xlu0 %2027 }
0x1bfc   :  { %v2030_v58 = vadd.f32 %v2028_v37, %v2020_v35 }
0x1bfe   :  { %3252 = vtanh.f32 %v2030_v58  ;;  %v2101_v57 = vrot.slane %v2030_v58, 6 }
0x1c08   :  { %v3253_v38 = vpop.eup %3252 }
0x1c09   :  { %2033 = vrot.lane.b32.xlu1 %v3253_v38, %s3328_s25 }
0x1c7b   :  { %v2034_v44 = vpop.permute.xlu1 %2033 }
0x1c7c   :  { %v2036_v27 = vmul.f32 %v3251_v42, %v2034_v44 }
0x1c7e   :  { %v2041_v17 = vpack.c.bf16 %v2036_v27, %v2036_v27  ;;  %v2038_v0 = vrot.slane %v2036_v27, 2 }
0x1c80   :  { %v2043_v41 = vrot.slane %v2041_v17, 1  ;;  %v2040_v5 = vmax.f32 %v3793_v18, %v2038_v0 }
0x1c82   :  { %2044 = vrot.lane.b32.xlu0 %v2043_v41, %s3329_s28 }
0x1cf4   :  { %v2045_v43 = vpop.permute.xlu0 %2044 }
0x1cf5   :  { %3039 = vmatmul.mubr.msk.bf16.vlgmr.msra.gmra.mrb[32].mxu0 %vm1069_vm3, %v2045_v43 }
0x1cf6   :  { %3051 = vmatpush3.bf16.msra.mxu0 %v3744_v39  ;;  %3054 = vmatprep.mubr.msk.bf16.mxu0 %vm3327_vm1, %v3326_v1 }
0x1cf7   :  { %3052 = vmatprep.subr.bf16.mxu0 %v3326_v1 }
0x1cfa   :  { %3053 = vmatpush3.bf16.msra.mxu0 %v3753_v4 }
0x1cfb   :  { %3066 = vmatprep.subr.bf16.mxu0 %v3326_v1 }
0x1dc8   :  { %v2083_v40 = vpop.f32.mrb[32].mxu0 }
0x1dc9   :  { %v2090_v45 = vrot.slane %v2083_v40, 4  ;;  %v3040_v46 = vpop.f32.mrb[33].mxu0 }
0x1dca   :  { %v2086_v47 = vpop.f32.mrb[34].mxu0 }
0x1dcb   :  { %v2092_v48 = vadd.f32 %v2090_v45, %v3785_v61  ;;  %v3041_v49 = vpop.f32.mrb[35].mxu0 }
0x1dcd   :  { %3254 = vtanh.f32 %v2092_v48  ;;  %v2706_v51 = vmul.f32 -1.442695, %v2092_v48 }
0x1dcf   :  { %3256 = vpow2.f32 %v2706_v51 }
0x1dd7   :  { %v3255_v50 = vpop.eup %3254 }
0x1dd8   :  { %2105 = vrot.lane.b32.xlu1 %v3255_v50, %s3328_s25 }
0x1dd9   :  { %v3257_v52 = vpop.eup %3256 }
0x1dda   :  { %v2096_v53 = vadd.f32 1.0, %v3257_v52 }
0x1ddc   :  { %3258 = vrcp.f32 %v2096_v53 }
0x1de6   :  { %v3259_v54 = vpop.eup %3258 }
0x1de7   :  { %v2103_v59 = vmul.f32 %v3259_v54, %v2101_v57 }
0x1e4a   :  { %v2106_v55 = vpop.permute.xlu1 %2105 }
0x1e4b   :  { %v2108_v56 = vmul.f32 %v3259_v54, %v2106_v55 }
0x1e4d   :  { %2110 = vrot.lane.b32.xlu0 %v2108_v56, %s3329_s28 }
0x1ebf   :  { %v2111_v60 = vpop.permute.xlu0 %2110 }
0x1ec0   :  { %v2113_v62 = vadd.f32 %v2111_v60, %v2103_v59 }
0x1ec2   :  { %3260 = vtanh.f32 %v2113_v62  ;;  %v2184_v25 = vrot.slane %v2113_v62, 6 }
0x1ecc   :  { %v3261_v63 = vpop.eup %3260 }
0x1ecd   :  { %2116 = vrot.lane.b32.xlu1 %v3261_v63, %s3328_s25 }
0x1f3f   :  { %v2117_v36 = vpop.permute.xlu1 %2116 }
0x1f40   :  { %v2119_v3 = vmul.f32 %v3259_v54, %v2117_v36 }
0x1f42   :  { %v2121_v6 = vrot.slane %v2119_v3, 4  ;;  %v2124_v7 = vpack.c.bf16 %v2119_v3, %v2119_v3 }
0x1f44   :  { %v2123_v8 = vmax.f32 %v2040_v5, %v2121_v6  ;;  %v2126_v9 = vrot.slane %v2124_v7, 2 }
0x1f46   :  { %2127 = vrot.lane.b32.xlu0 %v2126_v9, %s3329_s28 }
0x1fb8   :  { %v2128_v10 = vpop.permute.xlu0 %2127 }
0x1fb9   :  { %3047 = vmatmul.mubr.msk.bf16.vlgmr.msra.gmra.mrb[32].mxu1 %vm1069_vm3, %v2128_v10 }
0x1fba   :  { %3059 = vmatpush3.bf16.msra.mxu1 %v3744_v39  ;;  %3062 = vmatprep.mubr.msk.bf16.mxu1 %vm3327_vm1, %v3326_v1 }
0x1fbb   :  { %3060 = vmatprep.subr.bf16.mxu1 %v3326_v1 }
0x1fbe   :  { %3061 = vmatpush3.bf16.msra.mxu1 %v3753_v4 }
0x1fbf   :  { %3074 = vmatprep.subr.bf16.mxu1 %v3326_v1 }
0x208c   :  { %v2166_v11 = vpop.f32.mrb[32].mxu1 }
0x208d   :  { %v2173_v12 = vrot.slane %v2166_v11, 2  ;;  %v3048_v13 = vpop.f32.mrb[33].mxu1 }
0x208e   :  { %v2169_v14 = vpop.f32.mrb[34].mxu1 }
0x208f   :  { %v2175_v15 = vadd.f32 %v2173_v12, %v3785_v61  ;;  %v3049_v16 = vpop.f32.mrb[35].mxu1 }
0x2091   :  { %3262 = vtanh.f32 %v2175_v15  ;;  %v2708_v19 = vmul.f32 -1.442695, %v2175_v15 }
0x2093   :  { %3264 = vpow2.f32 %v2708_v19 }
0x209b   :  { %v3263_v18 = vpop.eup %3262 }
0x209c   :  { %2188 = vrot.lane.b32.xlu1 %v3263_v18, %s3328_s25 }
0x209d   :  { %v3265_v20 = vpop.eup %3264 }
0x209e   :  { %v2179_v21 = vadd.f32 1.0, %v3265_v20 }
0x20a0   :  { %3266 = vrcp.f32 %v2179_v21 }
0x20aa   :  { %v3267_v22 = vpop.eup %3266 }
0x20ab   :  { %v2186_v26 = vmul.f32 %v3267_v22, %v2184_v25 }
0x210e   :  { %v2189_v23 = vpop.permute.xlu1 %2188 }
0x210f   :  { %v2191_v24 = vmul.f32 %v3267_v22, %v2189_v23 }
0x2111   :  { %2193 = vrot.lane.b32.xlu0 %v2191_v24, %s3329_s28 }
0x2183   :  { %v2194_v28 = vpop.permute.xlu0 %2193 }
0x2184   :  { %v2196_v29 = vadd.f32 %v2194_v28, %v2186_v26 }
0x2186   :  { %3268 = vtanh.f32 %v2196_v29  ;;  %v2264_v48 = vrot.slane %v2196_v29, 6 }
0x2190   :  { %v3269_v61 = vpop.eup %3268 }
0x2191   :  { %2199 = vrot.lane.b32.xlu1 %v3269_v61, %s3328_s25 }
0x2203   :  { %v2200_v30 = vpop.permute.xlu1 %2199 }
0x2204   :  { %v2202_v31 = vmul.f32 %v3267_v22, %v2200_v30 }
0x2206   :  { %v2204_v42 = vrot.slane %v2202_v31, 6  ;;  %v2207_v32 = vpack.c.bf16 %v2202_v31, %v2202_v31 }
0x2208   :  { %v2209_v33 = vrot.slane %v2207_v32, 3  ;;  %v3834_v34 = vmax.f32 %v2123_v8, %v2204_v42 }
0x220a   :  { %2210 = vrot.lane.b32.xlu0 %v2209_v33, %s3329_s28 }
0x227c   :  { %v2211_v35 = vpop.permute.xlu0 %2210 }
0x227d   :  { %3055 = vmatmul.mubr.msk.bf16.vlgmr.msra.gmra.mrb[36].mxu0 %vm1069_vm3, %v2211_v35 }
0x227e   :  { %3067 = vmatpush3.bf16.msra.mxu0 %v3744_v39  ;;  %3070 = vmatprep.mubr.msk.bf16.mxu0 %vm3327_vm1, %v3326_v1 }
0x227f   :  { %3068 = vmatprep.subr.bf16.mxu0 %v3326_v1 }
0x2282   :  { %3069 = vmatpush3.bf16.msra.mxu0 %v3753_v4 }
0x2283   :  { %3082 = vmatprep.subr.bf16.mxu0 %v3326_v1 }
0x2350   :  { %v2249_v37 = vpop.f32.mrb[36].mxu0 }
0x2351   :  { %v2255_v58 = vadd.f32 %v2249_v37, %v3788_v2  ;;  %v3056_v38 = vpop.f32.mrb[37].mxu0 }
0x2352   :  { %v2252_v44 = vpop.f32.mrb[38].mxu0 }
0x2353   :  { %3270 = vtanh.f32 %v2255_v58  ;;  %v3057_v27 = vpop.f32.mrb[39].mxu0  ;;  %v2710_v41 = vmul.f32 -1.442695, %v2255_v58 }
0x2355   :  { %3272 = vpow2.f32 %v2710_v41 }
0x235d   :  { %v3271_v17 = vpop.eup %3270 }
0x235e   :  { %2268 = vrot.lane.b32.xlu1 %v3271_v17, %s3328_s25 }
0x235f   :  { %v3273_v43 = vpop.eup %3272 }
0x2360   :  { %v2259_v40 = vadd.f32 1.0, %v3273_v43 }
0x2362   :  { %3274 = vrcp.f32 %v2259_v40 }
0x236c   :  { %v3275_v45 = vpop.eup %3274 }
0x236d   :  { %v2266_v49 = vmul.f32 %v3275_v45, %v2264_v48 }
0x23d0   :  { %v2269_v46 = vpop.permute.xlu1 %2268 }
0x23d1   :  { %v2271_v47 = vmul.f32 %v3275_v45, %v2269_v46 }
0x23d3   :  { %2273 = vrot.lane.b32.xlu0 %v2271_v47, %s3329_s28 }
0x2445   :  { %v2274_v50 = vpop.permute.xlu0 %2273 }
0x2446   :  { %v2276_v51 = vadd.f32 %v2274_v50, %v2266_v49 }
0x2448   :  { %3276 = vtanh.f32 %v2276_v51 }
0x2452   :  { %v3277_v52 = vpop.eup %3276 }
0x2453   :  { %2279 = vrot.lane.b32.xlu1 %v3277_v52, %s3328_s25 }
0x24c5   :  { %v2280_v53 = vpop.permute.xlu1 %2279 }
0x24c6   :  { %v2282_v54 = vmul.f32 %v3275_v45, %v2280_v53 }
0x24c8   :  { %v2283_v55 = vmax.f32 %v3834_v34, %v2282_v54  ;;  %v2284_v56 = vpack.c.bf16 %v2282_v54, %v2282_v54 }
0x24ca   :  { %2286 = vrot.lane.b32.xlu0 %v2284_v56, %s3329_s28 }
0x253c   :  { %v2287_v57 = vpop.permute.xlu0 %2286 }
0x253d   :  { %3063 = vmatmul.mubr.msk.bf16.vlgmr.msra.gmra.mrb[36].mxu1 %vm1069_vm3, %v2287_v57 }
0x253e   :  { %3075 = vmatpush3.bf16.msra.mxu1 %v3744_v39  ;;  %3078 = vmatprep.mubr.msk.bf16.mxu1 %vm3327_vm1, %v3326_v1 }
0x253f   :  { %3076 = vmatprep.subr.bf16.mxu1 %v3326_v1 }
0x2542   :  { %3077 = vmatpush3.bf16.msra.mxu1 %v3753_v4  ;;  %v2343_v4 = vrot.slane %v2276_v51, 6 }
0x2610   :  { %v2325_v59 = vpop.f32.mrb[36].mxu1 }
0x2611   :  { %v2332_v60 = vrot.slane %v2325_v59, 6  ;;  %v3064_v62 = vpop.f32.mrb[37].mxu1 }
0x2612   :  { %v2328_v63 = vpop.f32.mrb[38].mxu1 }
0x2613   :  { %v2334_v0 = vadd.f32 %v2332_v60, %v3788_v2  ;;  %v3065_v36 = vpop.f32.mrb[39].mxu1 }
0x2614   :  { %v3173_v36 = vld [vmem:[%s3907_s9 + $0x8] sm:$0xff]  }
0x2615   :  { %3278 = vtanh.f32 %v2334_v0  ;;  %v2712_v5 = vmul.f32 -1.442695, %v2334_v0 }
0x2617   :  { %3280 = vpow2.f32 %v2712_v5 }
0x261f   :  { %v3279_v3 = vpop.eup %3278 }
0x2620   :  { %2347 = vrot.lane.b32.xlu1 %v3279_v3, %s3328_s25 }
0x2621   :  { %v3281_v39 = vpop.eup %3280 }
0x2622   :  { %v2338_v6 = vadd.f32 1.0, %v3281_v39 }
0x2624   :  { %3282 = vrcp.f32 %v2338_v6 }
0x262e   :  { %v3283_v7 = vpop.eup %3282 }
0x262f   :  { %v2345_v10 = vmul.f32 %v3283_v7, %v2343_v4  ;;  %v2717_v4 = vld [vmem:[%s3908_s10] ss:$0 sm:$0xff] }
0x2692   :  { %v2348_v8 = vpop.permute.xlu1 %2347 }
0x2693   :  { %v2350_v9 = vmul.f32 %v3283_v7, %v2348_v8 }
0x2695   :  { %2352 = vrot.lane.b32.xlu0 %v2350_v9, %s3329_s28 }
0x2707   :  { %v2353_v11 = vpop.permute.xlu0 %2352 }
0x2708   :  { %v2355_v12 = vadd.f32 %v2353_v11, %v2345_v10 }
0x270a   :  { %3284 = vtanh.f32 %v2355_v12  ;;  %v2426_v34 = vrot.slane %v2355_v12, 6 }
0x2714   :  { %v3285_v13 = vpop.eup %3284 }
0x2715   :  { %2358 = vrot.lane.b32.xlu1 %v3285_v13, %s3328_s25 }
0x2787   :  { %v2359_v14 = vpop.permute.xlu1 %2358 }
0x2788   :  { %v2361_v15 = vmul.f32 %v3283_v7, %v2359_v14 }
0x278a   :  { %v2363_v16 = vrot.slane %v2361_v15, 2  ;;  %v2366_v18 = vpack.c.bf16 %v2361_v15, %v2361_v15 }
0x278c   :  { %v2365_v19 = vmax.f32 %v2283_v55, %v2363_v16  ;;  %v2368_v20 = vrot.slane %v2366_v18, 1 }
0x278e   :  { %2369 = vrot.lane.b32.xlu0 %v2368_v20, %s3329_s28 }
0x2800   :  { %v2370_v21 = vpop.permute.xlu0 %2369 }
0x2801   :  { %3071 = vmatmul.mubr.msk.bf16.vlgmr.msra.gmra.mrb[40].mxu0 %vm1069_vm3, %v2370_v21 }
0x2802   :  { %3086 = vmatprep.mubr.msk.bf16.mxu0 %vm3327_vm1, %v3326_v1 }
0x28d4   :  { %v2408_v22 = vpop.f32.mrb[40].mxu0 }
0x28d5   :  { %v2415_v23 = vrot.slane %v2408_v22, 4  ;;  %v3072_v24 = vpop.f32.mrb[41].mxu0 }
0x28d6   :  { %v2411_v25 = vpop.f32.mrb[42].mxu0 }
0x28d7   :  { %v2417_v26 = vadd.f32 %v2415_v23, %v3788_v2  ;;  %v3073_v28 = vpop.f32.mrb[43].mxu0 }
0x28d9   :  { %3286 = vtanh.f32 %v2417_v26  ;;  %v2714_v61 = vmul.f32 -1.442695, %v2417_v26 }
0x28db   :  { %3288 = vpow2.f32 %v2714_v61 }
0x28e3   :  { %v3287_v29 = vpop.eup %3286 }
0x28e4   :  { %2430 = vrot.lane.b32.xlu1 %v3287_v29, %s3328_s25 }
0x28e5   :  { %v3289_v30 = vpop.eup %3288 }
0x28e6   :  { %v2421_v31 = vadd.f32 1.0, %v3289_v30 }
0x28e8   :  { %3290 = vrcp.f32 %v2421_v31 }
0x28f2   :  { %v3291_v42 = vpop.eup %3290 }
0x28f3   :  { %v2428_v35 = vmul.f32 %v3291_v42, %v2426_v34 }
0x2956   :  { %v2431_v32 = vpop.permute.xlu1 %2430 }
0x2957   :  { %v2433_v33 = vmul.f32 %v3291_v42, %v2431_v32 }
0x2959   :  { %2435 = vrot.lane.b32.xlu0 %v2433_v33, %s3329_s28 }
0x29cb   :  { %v2436_v37 = vpop.permute.xlu0 %2435 }
0x29cc   :  { %v2438_v58 = vadd.f32 %v2436_v37, %v2428_v35 }
0x29ce   :  { %3292 = vtanh.f32 %v2438_v58  ;;  %v2509_v60 = vrot.slane %v2438_v58, 6 }
0x29d8   :  { %v3293_v38 = vpop.eup %3292 }
0x29d9   :  { %2441 = vrot.lane.b32.xlu1 %v3293_v38, %s3328_s25 }
0x2a4b   :  { %v2442_v44 = vpop.permute.xlu1 %2441 }
0x2a4c   :  { %v2444_v27 = vmul.f32 %v3291_v42, %v2442_v44 }
0x2a4e   :  { %v2446_v17 = vrot.slane %v2444_v27, 4  ;;  %v2449_v41 = vpack.c.bf16 %v2444_v27, %v2444_v27 }
0x2a50   :  { %v2448_v43 = vmax.f32 %v2365_v19, %v2446_v17  ;;  %v2451_v40 = vrot.slane %v2449_v41, 2 }
0x2a52   :  { %2452 = vrot.lane.b32.xlu0 %v2451_v40, %s3329_s28 }
0x2ac4   :  { %v2453_v45 = vpop.permute.xlu0 %2452 }
0x2ac5   :  { %3079 = vmatmul.mubr.msk.bf16.vlgmr.msra.gmra.mrb[40].mxu1 %vm1069_vm3, %v2453_v45 }
0x2b98   :  { %v2491_v46 = vpop.f32.mrb[40].mxu1 }
0x2b99   :  { %v2498_v47 = vrot.slane %v2491_v46, 2  ;;  %v3080_v48 = vpop.f32.mrb[41].mxu1 }
0x2b9a   :  { %v2494_v49 = vpop.f32.mrb[42].mxu1 }
0x2b9b   :  { %v2500_v50 = vadd.f32 %v2498_v47, %v3788_v2  ;;  %v3081_v51 = vpop.f32.mrb[43].mxu1  ;;  %v3172_v2 = vld [vmem:[%s3907_s9] sm:$0xff]   ;;  %s3330_s9 = smov [#allocation3]  }
0x2b9c   :  { %3083 = vmatpush3.bf16.msra.mxu0 %v3172_v2  ;;  %s2610_s23 = sshll.u32 %s3330_s9, 4  ;;  %s2611_s23 = int_to_ptr.vmem [resolvable:$true] %s2610_s23 }
0x2b9d   :  { %3294 = vtanh.f32 %v2500_v50  ;;  %v2716_v53 = vmul.f32 -1.442695, %v2500_v50  ;;  %3084 = vmatprep.subr.bf16.mxu0 %v3326_v1  ;;  %s3302_s24 = scalar_lea.vmem %s2611_s23, 32  ;;  %p3307_p1 = scmp.lt.s32.totalorder %s2611_s23, %s2611_s23 }
0x2b9e   :  { %p3303_p0 = scmp.ne.s32.totalorder %s2611_s23, %s3302_s24  ;;  %p3308_p2 = scmp.lt.s32.totalorder %s3302_s24, %s3302_s24 }
0x2b9f   :  { %3296 = vpow2.f32 %v2716_v53 }
0x2ba0   :  { %3085 = vmatpush3.bf16.msra.mxu0 %v3173_v36  ;;  %p3309_p3 = por %p3308_p2, %p3307_p1 }
0x2ba2   :  { %p3310_p4 = pnand %p3309_p3, %p3303_p0 }
0x2ba7   :  { %v3295_v52 = vpop.eup %3294 }
0x2ba8   :  { %2513 = vrot.lane.b32.xlu1 %v3295_v52, %s3328_s25 }
0x2ba9   :  { %v3297_v54 = vpop.eup %3296 }
0x2baa   :  { %v2504_v55 = vadd.f32 1.0, %v3297_v54 }
0x2bac   :  { %3298 = vrcp.f32 %v2504_v55 }
0x2bb6   :  { %v3299_v56 = vpop.eup %3298 }
0x2bb7   :  { %v2511_v62 = vmul.f32 %v3299_v56, %v2509_v60 }
0x2c1a   :  { %v2514_v57 = vpop.permute.xlu1 %2513 }
0x2c1b   :  { %v2516_v59 = vmul.f32 %v3299_v56, %v2514_v57 }
0x2c1d   :  { %2518 = vrot.lane.b32.xlu0 %v2516_v59, %s3329_s28 }
0x2c8f   :  { %v2519_v63 = vpop.permute.xlu0 %2518 }
0x2c90   :  { %v2521_v0 = vadd.f32 %v2519_v63, %v2511_v62 }
0x2c92   :  { %3300 = vtanh.f32 %v2521_v0 }
0x2c9c   :  { %v3301_v3 = vpop.eup %3300 }
0x2c9d   :  { %2524 = vrot.lane.b32.xlu1 %v3301_v3, %s3328_s25 }
0x2d0f   :  { %v2525_v5 = vpop.permute.xlu1 %2524 }
0x2d10   :  { %v2527_v39 = vmul.f32 %v3299_v56, %v2525_v5 }
0x2d12   :  { %v2529_v6 = vrot.slane %v2527_v39, 6 }
0x2d14   :  { %v2531_v7 = vmax.f32 %v2448_v43, %v2529_v6 }
0x2d16   :  { %v2532_v8 = vpack.c.bf16 %v2531_v7, %v2531_v7 }
0x2d18   :  { %2545 = vrot.lane.b32.xlu0 %v2532_v8, %s3329_s28 }
0x2d8a   :  { %v2546_v9 = vpop.permute.xlu0 %2545 }
0x2d8b   :  { %3087 = vmatmul.mubr.msk.bf16.vlgmr.msra.gmra.mrb[44].mxu0 %vm1069_vm3, %v2546_v9 }
0x2e5e   :  { %v2596_v1 = vpop.f32.mrb[44].mxu0 }
0x2e5f   :  { %v2597_v10 = vadd.f32 %v2717_v4, %v2596_v1  ;;  %v3088_v11 = vpop.f32.mrb[45].mxu0 }
0x2e60   :  { %v2599_v12 = vpop.f32.mrb[46].mxu0 }
0x2e61   :  { %v3089_v13 = vpop.f32.mrb[47].mxu0  ;;  %2603 = vst.msk [vmem:[#allocation3] sm:$0x3] %vm2602_vm8, %v2597_v10 }
0x2e62   :  { %3313 = shalt.err (!%p3310_p4)
}
0x2e63   :  { %s3314_s10 = scalar_lea.hbm %s3909_s11, 32 }
0x2e64   :  { %p3315_p5 = scmp.ne.s32.totalorder %s3909_s11, %s3314_s10  ;;  %p3318_p6 = scmp.lt.u32.totalorder %s3314_s10, %s3909_s11 }
0x2e66   :  { %p3320_p7 = pnand %p3318_p6, %p3315_p5 }
0x2e68   :  { %3323 = shalt.err (!%p3320_p7)
}
0x2e69   :  { %2613 = dma.vmem_to_hbm [thread:$0]  %s2611_s23, 32, %s3909_s11, [#allocation4]  }
0x2e6a   :  { %3324 = dma.done.wait [#allocation4], 32  }
0x2e6b   :  { %3325 = vsyncadd [#allocation4], 4294967264 }
0x2e6c   :  { %2617 = vsyncpa [#allocation4], 1 }

</bundles_post_ra>
